<compile_context>
chip_gen: v7x
topology: tpu7x:2x2x1
jax: 0.10.0
libtpu: 0.0.40
codegen_flags: <defaults>
</compile_context>

<pallas_src>
import functools

import jax
import jax.numpy as jnp
from jax.experimental import pallas as pl
from jax.experimental.pallas import tpu as pltpu  # noqa: F401  (TPU backend)


HEAD_W = 192  # lane width of the head slab (= 3 * 64, packed first-layer width)


def _r16(n):
    """Round up to a multiple of 16 (bf16 sublane-pack alignment)."""
    return ((n + 15) // 16) * 16


def lstm_slab_offsets(input_size, hidden_size):
    """Row offsets of [W_ih1; W_hh1; W_ih2; W_hh2] inside the LSTM slab."""
    o_ih1 = 0
    o_hh1 = o_ih1 + _r16(input_size)
    o_ih2 = o_hh1 + _r16(hidden_size)
    o_hh2 = o_ih2 + _r16(hidden_size)
    total = o_hh2 + _r16(hidden_size)
    return o_ih1, o_hh1, o_ih2, o_hh2, total


def head_slab_offsets(hidden_size, output_size):
    """Row offsets of [Wh1; W2_blockdiag; W3_blockdiag; Wm4] in the head slab."""
    c2 = 32 + output_size * output_size + 8
    o_wh1 = 0
    o_w2 = o_wh1 + _r16(hidden_size + output_size)
    o_w3 = o_w2 + 192                      # layer-2 input width is 3*64
    o_w4 = o_w3 + _r16(c2)
    total = o_w4 + _r16(16)
    return o_wh1, o_w2, o_w3, o_w4, total


# ----------------------------------------------------------------------------
# Fused kernel: 2-layer LSTM (hoisted projections, unrolled over T) + heads
# ----------------------------------------------------------------------------
def fused_lstm_dqn_kernel(x_ref, act_ref, wl_ref, wh_ref, bs_ref, out_ref,
                          *, input_size, hidden_size, seq_len, output_size):
    I, H, T, O = input_size, hidden_size, seq_len, output_size
    G = 4 * H
    B = act_ref.shape[0]
    f32, bf16 = jnp.float32, jnp.bfloat16

    # Static slab offsets (Python ints).
    o_ih1, o_hh1, o_ih2, o_hh2, _ = lstm_slab_offsets(I, H)
    o_wh1, o_w2, o_w3, o_w4, _ = head_slab_offsets(H, O)
    C2 = 32 + O * O + 8                    # width of block-diag layer-2 output

    # Biases (f32) — single load, static row slices.
    bs = bs_ref[...]
    b1 = bs[0:1, 0:G]
    b2 = bs[1:2, 0:G]
    bh1 = bs[2:3, 0:HEAD_W]
    b2b = bs[3:4, 0:HEAD_W]
    b3b = bs[4:5, 0:HEAD_W]
    b4b = bs[5:6, 0:HEAD_W]

    # LSTM weights (bf16), static row slices of the packed slab.
    w_ih1 = wl_ref[o_ih1:o_ih1 + I, :]
    w_hh1 = wl_ref[o_hh1:o_hh1 + H, :]
    w_ih2 = wl_ref[o_ih2:o_ih2 + H, :]
    w_hh2 = wl_ref[o_hh2:o_hh2 + H, :]

    def mm(x, w):  # bf16 MXU operands, f32 accumulation
        return jnp.dot(x.astype(bf16), w, preferred_element_type=f32)

    def lrelu(x):  # F.leaky_relu default negative_slope = 0.01
        return jnp.where(x > 0, x, 0.01 * x)

    def lstm_scan(gx, w_hh):
        """gx: (B, T, 4H) precomputed input projection (bias folded in)."""
        h = jnp.zeros((B, H), f32)
        c = jnp.zeros((B, H), f32)
        hs = []
        for t in range(T):                           # fully unrolled (static T)
            gates = gx[:, t, :] + mm(h, w_hh)        # only the recurrence is serial
            sg = jax.nn.sigmoid(gates)               # whole-vreg activations,
            th = jnp.tanh(gates)                     # then slice (i, f, g, o)
            i_g = sg[:, 0 * H:1 * H]
            f_g = sg[:, 1 * H:2 * H]
            g_g = th[:, 2 * H:3 * H]
            o_g = sg[:, 3 * H:4 * H]
            c = f_g * c + i_g * g_g
            h = o_g * jnp.tanh(c)
            hs.append(h)
        return h, hs

    # ---- Layer 1: one batched input projection for all T steps -------------
    x2d = x_ref[...]                                            # (B*T, I)
    gx1 = (mm(x2d, w_ih1) + b1).reshape(B, T, G)
    _, h1_all = lstm_scan(gx1, w_hh1)

    # ---- Layer 2: one batched projection of the layer-1 outputs ------------
    h1_seq = jnp.stack(h1_all, axis=1).reshape(B * T, H)        # (B*T, H)
    gx2 = (mm(h1_seq, w_ih2) + b2).reshape(B, T, G)
    h2_T, _ = lstm_scan(gx2, w_hh2)                             # last-step hidden

    # ---- Heads --------------------------------------------------------------
    # feat = [h2_T | action]: split into two dots (no lane concat).  The action
    # part does not depend on the LSTM, so it sits off the critical path.
    wh1_h = wh_ref[o_wh1:o_wh1 + H, :]
    wh1_a = wh_ref[o_wh1 + H:o_wh1 + H + O, :]
    act_proj = mm(act_ref[...], wh1_a) + bh1
    h_all = lrelu(mm(h2_T, wh1_h) + act_proj)                   # (B, 192)

    # Block-diagonal second layer of all three heads (one matmul).
    out2 = mm(h_all, wh_ref[o_w2:o_w2 + 192, :]) + b2b          # (B, 192)
    sm = out2[:, 32:32 + O * O]                                 # sigma_matrix (flat)
    act2 = lrelu(out2)

    # Block-diagonal third layer (mu layer-3 + sigma_v layer-3, one matmul).
    out3 = mm(act2[:, 0:C2], wh_ref[o_w3:o_w3 + C2, :]) + b3b   # (B, 192)
    sv = out3[:, 16:17]                                         # sigma_vector
    m3 = lrelu(out3[:, 0:16])

    # Final mu layer + exact softmax (no approx reciprocal).
    z = (mm(m3, wh_ref[o_w4:o_w4 + 16, :]) + b4b)[:, 0:O]
    z = z - jnp.max(z, axis=1, keepdims=True)
    e = jnp.exp(z)
    mu = e / jnp.sum(e, axis=1, keepdims=True)

    # Lane-dense packed output: [mu | sigma_matrix | sigma_vector | zero pad].
    pad_w = out_ref.shape[1] - (O + O * O + 1)
    out_ref[...] = jnp.concatenate(
        [mu, sm, sv, jnp.zeros((B, pad_w), f32)], axis=1)


# ----------------------------------------------------------------------------
# Wrapper
# ----------------------------------------------------------------------------
def run_fused(env_state, action_state, wl, wh, bs, *,
              input_size, hidden_size, output_size):
    B, T, I = env_state.shape
    x2d = env_state.reshape(B * T, I)            # contiguous reshape (no transpose)

    n_packed = output_size + output_size * output_size + 1
    out_w = ((n_packed + 127) // 128) * 128      # lane-dense output width

    kernel = functools.partial(
        fused_lstm_dqn_kernel, input_size=input_size, hidden_size=hidden_size,
        seq_len=T, output_size=output_size)

    # Single invocation: no grid, whole (tiny) arrays resident in VMEM.
    out = pl.pallas_call(
        kernel,
        out_shape=jax.ShapeDtypeStruct((B, out_w), jnp.float32),
    )(x2d, action_state, wl, wh, bs)

    mu = out[:, :output_size]
    sm = out[:, output_size:output_size + output_size * output_size]
    sv = out[:, output_size + output_size * output_size:n_packed]
    return mu, sm.reshape((-1, output_size, output_size)), sv


@functools.partial(jax.jit,
                   static_argnames=("input_size", "hidden_size", "output_size"))
def lstm_dqn_forward(env_state, action_state, wl, wh, bs,
                     input_size, hidden_size, output_size):
    return run_fused(env_state, action_state, wl, wh, bs,
                     input_size=input_size, hidden_size=hidden_size,
                     output_size=output_size)


# ----------------------------------------------------------------------------
# Parameter construction (deterministic, synthetic) and slab packing
# ----------------------------------------------------------------------------
def make_params(key, input_size, hidden_size, output_size):
    keys = iter(jax.random.split(key, 40))

    def rnd(shape, scale=0.1):
        return (scale * jax.random.normal(next(keys), shape)).astype(jnp.float32)

    H, I, O = hidden_size, input_size, output_size
    cat = H + O
    p = {}
    # LSTM (weights stored (in, 4H) so the kernel does x @ W; gate order i,f,g,o)
    p["wih1"], p["whh1"] = rnd((I, 4 * H)), rnd((H, 4 * H))
    p["bih1"], p["bhh1"] = rnd((1, 4 * H)), rnd((1, 4 * H))
    p["wih2"], p["whh2"] = rnd((H, 4 * H)), rnd((H, 4 * H))
    p["bih2"], p["bhh2"] = rnd((1, 4 * H)), rnd((1, 4 * H))
    # Heads
    p["wm1"], p["bm1"] = rnd((cat, 64)), rnd((1, 64))
    p["wm2"], p["bm2"] = rnd((64, 32)), rnd((1, 32))
    p["wm3"], p["bm3"] = rnd((32, 16)), rnd((1, 16))
    p["wm4"], p["bm4"] = rnd((16, O)), rnd((1, O))
    p["ws1"], p["bs1"] = rnd((cat, 64)), rnd((1, 64))
    p["ws2"], p["bs2"] = rnd((64, O * O)), rnd((1, O * O))
    p["wv1"], p["bv1"] = rnd((cat, 64)), rnd((1, 64))
    p["wv2"], p["bv2"] = rnd((64, 8)), rnd((1, 8))
    p["wv3"], p["bv3"] = rnd((8, 1)), rnd((1, 1))
    return p


def pack_params(p, input_size, hidden_size, output_size):
    """Pack all parameters into 3 lane-dense slabs (2x bf16 weights, 1x f32 bias)."""
    I, H, O = input_size, hidden_size, output_size
    G = 4 * H
    C2 = 32 + O * O + 8

    # LSTM weight slab (bf16), width 4H, 16-row aligned segments.
    o_ih1, o_hh1, o_ih2, o_hh2, n_l = lstm_slab_offsets(I, H)
    wl = jnp.zeros((n_l, G), jnp.float32)
    wl = wl.at[o_ih1:o_ih1 + I].set(p["wih1"])
    wl = wl.at[o_hh1:o_hh1 + H].set(p["whh1"])
    wl = wl.at[o_ih2:o_ih2 + H].set(p["wih2"])
    wl = wl.at[o_hh2:o_hh2 + H].set(p["whh2"])
    wl = wl.astype(jnp.bfloat16)

    # Head weight slab (bf16), width 192.
    o_wh1, o_w2, o_w3, o_w4, n_h = head_slab_offsets(H, O)
    wh = jnp.zeros((n_h, HEAD_W), jnp.float32)
    wh1 = jnp.concatenate([p["wm1"], p["ws1"], p["wv1"]], axis=1)   # (H+O, 192)
    wh = wh.at[o_wh1:o_wh1 + H + O].set(wh1)
    # layer-2 block diagonal: rows = 3*64 first-layer features, cols = [mu2|sm2|sv2]
    wh = wh.at[o_w2 + 0:o_w2 + 64, 0:32].set(p["wm2"])
    wh = wh.at[o_w2 + 64:o_w2 + 128, 32:32 + O * O].set(p["ws2"])
    wh = wh.at[o_w2 + 128:o_w2 + 192, 32 + O * O:C2].set(p["wv2"])
    # layer-3 block diagonal: rows = layer-2 outputs (C2), cols = [mu3 | sv3]
    wh = wh.at[o_w3 + 0:o_w3 + 32, 0:16].set(p["wm3"])
    wh = wh.at[o_w3 + 32 + O * O:o_w3 + C2, 16:17].set(p["wv3"])
    # final mu layer
    wh = wh.at[o_w4:o_w4 + 16, 0:O].set(p["wm4"])
    wh = wh.astype(jnp.bfloat16)

    # Bias slab (f32), (8, 192): one row per fused bias, zero padded.
    bw = max(G, HEAD_W)
    bs = jnp.zeros((8, bw), jnp.float32)
    bs = bs.at[0, 0:G].set((p["bih1"] + p["bhh1"])[0])
    bs = bs.at[1, 0:G].set((p["bih2"] + p["bhh2"])[0])
    bs = bs.at[2, 0:HEAD_W].set(
        jnp.concatenate([p["bm1"], p["bs1"], p["bv1"]], axis=1)[0])
    bs = bs.at[3, 0:C2].set(
        jnp.concatenate([p["bm2"], p["bs2"], p["bv2"]], axis=1)[0])
    bs = bs.at[4, 0:17].set(jnp.concatenate([p["bm3"], p["bv3"]], axis=1)[0])
    bs = bs.at[5, 0:O].set(p["bm4"][0])
    return wl, wh, bs


# ----------------------------------------------------------------------------
# Pure-JAX reference (standard unfused formulation, matching matmul precision)
# ----------------------------------------------------------------------------
def reference_forward(env_state, action_state, p, output_size):
    B, T, I = env_state.shape
    H = p["whh1"].shape[0]
    O = output_size

    def mm(x, w):  # mirror kernel numerics: bf16 operands, f32 accumulation
        return jnp.dot(x.astype(jnp.bfloat16), w.astype(jnp.bfloat16),
                       preferred_element_type=jnp.float32)

    def cell(x_t, h, c, wih, whh, b):
        gates = mm(x_t, wih) + mm(h, whh) + b
        i = jax.nn.sigmoid(gates[:, 0 * H:1 * H])
        f = jax.nn.sigmoid(gates[:, 1 * H:2 * H])
        g = jnp.tanh(gates[:, 2 * H:3 * H])
        o = jax.nn.sigmoid(gates[:, 3 * H:4 * H])
        c = f * c + i * g
        h = o * jnp.tanh(c)
        return h, c

    b1 = p["bih1"] + p["bhh1"]
    b2 = p["bih2"] + p["bhh2"]
    h1 = c1 = h2 = c2 = jnp.zeros((B, H), jnp.float32)
    for t in range(T):
        h1, c1 = cell(env_state[:, t, :], h1, c1, p["wih1"], p["whh1"], b1)
        h2, c2 = cell(h1, h2, c2, p["wih2"], p["whh2"], b2)

    feat = jnp.concatenate([h2, action_state], axis=1)
    lrelu = lambda x: jnp.where(x > 0, x, 0.01 * x)

    m = lrelu(mm(feat, p["wm1"]) + p["bm1"])
    m = lrelu(mm(m, p["wm2"]) + p["bm2"])
    m = lrelu(mm(m, p["wm3"]) + p["bm3"])
    mu = jax.nn.softmax(mm(m, p["wm4"]) + p["bm4"], axis=1)

    s = lrelu(mm(feat, p["ws1"]) + p["bs1"])
    sm = mm(s, p["ws2"]) + p["bs2"]

    v = lrelu(mm(feat, p["wv1"]) + p["bv1"])
    v = lrelu(mm(v, p["wv2"]) + p["bv2"])
    sv = mm(v, p["wv3"]) + p["bv3"]
    return mu, sm.reshape((-1, O, O)), sv


if __name__ == "__main__":
    B, T, INPUT, HIDDEN, OUTPUT = 2, 8, 16, 32, 4

    key = jax.random.PRNGKey(0)
    k_env, k_act, k_par = jax.random.split(key, 3)
    env_state = jax.random.normal(k_env, (B, T, INPUT), dtype=jnp.float32)
    action_state = jax.random.normal(k_act, (B, OUTPUT), dtype=jnp.float32)
    params = make_params(k_par, INPUT, HIDDEN, OUTPUT)
    wl, wh, bs = pack_params(params, INPUT, HIDDEN, OUTPUT)

    mu, sigma_matrix, sigma_vector = lstm_dqn_forward(
        env_state, action_state, wl, wh, bs,
        input_size=INPUT, hidden_size=HIDDEN, output_size=OUTPUT)
    jax.block_until_ready((mu, sigma_matrix, sigma_vector))

    mu_r, sm_r, sv_r = reference_forward(env_state, action_state, params, OUTPUT)
    assert mu.shape == (B, OUTPUT)
    assert sigma_matrix.shape == (B, OUTPUT, OUTPUT)
    assert sigma_vector.shape == (B, 1)
    # Tolerances sized for bf16 matmul operands with f32 accumulation.
    assert jnp.allclose(jnp.sum(mu, axis=1), 1.0, atol=1e-4)
    assert jnp.allclose(mu, mu_r, rtol=1e-2, atol=1e-3)
    assert jnp.allclose(sigma_matrix, sm_r, rtol=1e-2, atol=1e-3)
    assert jnp.allclose(sigma_vector, sv_r, rtol=1e-2, atol=1e-3)

    print("KERNEL_OK")
</pallas_src>

<mosaic_0001>
module attributes {stable_mosaic.version = 11 : i64} {
  func.func @fused_lstm_dqn_kernel(%arg0: memref<16x16xf32, #tpu.memory_space<vmem>>, %arg1: memref<2x4xf32, #tpu.memory_space<vmem>>, %arg2: memref<112x128xbf16, #tpu.memory_space<vmem>>, %arg3: memref<320x192xbf16, #tpu.memory_space<vmem>>, %arg4: memref<8x192xf32, #tpu.memory_space<vmem>>, %arg5: memref<2x128xf32, #tpu.memory_space<vmem>>) attributes {dimension_semantics = [], scalar_prefetch = 0 : i64, scratch_operands = 0 : i64, tpu.core_type = #tpu.core_type<tc>} {
    %c0 = arith.constant 0 : index
    %c0_0 = arith.constant 0 : index
    %0 = vector.load %arg4[%c0, %c0_0] : memref<8x192xf32, #tpu.memory_space<vmem>>, vector<8x192xf32>
    %1 = vector.extract_strided_slice %0 {offsets = [0, 0], sizes = [1, 128], strides = [1, 1]} : vector<8x192xf32> to vector<1x128xf32>
    %2 = vector.extract_strided_slice %0 {offsets = [1, 0], sizes = [1, 128], strides = [1, 1]} : vector<8x192xf32> to vector<1x128xf32>
    %3 = vector.extract_strided_slice %0 {offsets = [2, 0], sizes = [1, 192], strides = [1, 1]} : vector<8x192xf32> to vector<1x192xf32>
    %4 = vector.extract_strided_slice %0 {offsets = [3, 0], sizes = [1, 192], strides = [1, 1]} : vector<8x192xf32> to vector<1x192xf32>
    %5 = vector.extract_strided_slice %0 {offsets = [4, 0], sizes = [1, 192], strides = [1, 1]} : vector<8x192xf32> to vector<1x192xf32>
    %6 = vector.extract_strided_slice %0 {offsets = [5, 0], sizes = [1, 192], strides = [1, 1]} : vector<8x192xf32> to vector<1x192xf32>
    %c0_1 = arith.constant 0 : index
    %c0_2 = arith.constant 0 : index
    %7 = vector.load %arg2[%c0_1, %c0_2] : memref<112x128xbf16, #tpu.memory_space<vmem>>, vector<16x128xbf16>
    %c16 = arith.constant 16 : index
    %c0_3 = arith.constant 0 : index
    %8 = vector.load %arg2[%c16, %c0_3] : memref<112x128xbf16, #tpu.memory_space<vmem>>, vector<32x128xbf16>
    %c48 = arith.constant 48 : index
    %c0_4 = arith.constant 0 : index
    %9 = vector.load %arg2[%c48, %c0_4] : memref<112x128xbf16, #tpu.memory_space<vmem>>, vector<32x128xbf16>
    %c80 = arith.constant 80 : index
    %c0_5 = arith.constant 0 : index
    %10 = vector.load %arg2[%c80, %c0_5] : memref<112x128xbf16, #tpu.memory_space<vmem>>, vector<32x128xbf16>
    %c0_6 = arith.constant 0 : index
    %c0_7 = arith.constant 0 : index
    %11 = vector.load %arg0[%c0_6, %c0_7] : memref<16x16xf32, #tpu.memory_space<vmem>>, vector<16x16xf32>
    %12 = arith.truncf %11 : vector<16x16xf32> to vector<16x16xbf16>
    %cst = arith.constant dense<0.000000e+00> : vector<16x128xf32>
    %13 = tpu.matmul %12, %7, %cst {dimension_numbers = #tpu.dot_dimension_numbers<[1], [0], [0], [1], [0, 0, 1, 1], [], []>} : vector<16x16xbf16>, vector<16x128xbf16>, vector<16x128xf32> -> vector<16x128xf32>
    %14 = vector.broadcast %1 : vector<1x128xf32> to vector<16x128xf32>
    %15 = arith.addf %13, %14 : vector<16x128xf32>
    %16 = vector.shape_cast %15 : vector<16x128xf32> to vector<2x8x128xf32>
    %cst_8 = arith.constant 0.000000e+00 : f32
    %17 = vector.broadcast %cst_8 : f32 to vector<2x32xf32>
    %cst_9 = arith.constant 0.000000e+00 : f32
    %18 = vector.broadcast %cst_9 : f32 to vector<2x32xf32>
    %19 = vector.extract_strided_slice %16 {offsets = [0, 0, 0], sizes = [2, 1, 128], strides = [1, 1, 1]} : vector<2x8x128xf32> to vector<2x1x128xf32>
    %20 = vector.shape_cast %19 : vector<2x1x128xf32> to vector<2x128xf32>
    %21 = arith.truncf %17 : vector<2x32xf32> to vector<2x32xbf16>
    %cst_10 = arith.constant dense<0.000000e+00> : vector<2x128xf32>
    %22 = tpu.matmul %21, %8, %cst_10 {dimension_numbers = #tpu.dot_dimension_numbers<[1], [0], [0], [1], [0, 0, 1, 1], [], []>} : vector<2x32xbf16>, vector<32x128xbf16>, vector<2x128xf32> -> vector<2x128xf32>
    %23 = arith.addf %20, %22 : vector<2x128xf32>
    %24 = arith.negf %23 : vector<2x128xf32>
    %25 = math.exp %24 : vector<2x128xf32>
    %cst_11 = arith.constant 1.000000e+00 : f32
    %26 = vector.broadcast %cst_11 : f32 to vector<2x128xf32>
    %27 = arith.addf %26, %25 : vector<2x128xf32>
    %28 = arith.divf %26, %27 : vector<2x128xf32>
    %29 = math.tanh %23 : vector<2x128xf32>
    %30 = vector.extract_strided_slice %28 {offsets = [0, 0], sizes = [2, 32], strides = [1, 1]} : vector<2x128xf32> to vector<2x32xf32>
    %31 = vector.extract_strided_slice %28 {offsets = [0, 32], sizes = [2, 32], strides = [1, 1]} : vector<2x128xf32> to vector<2x32xf32>
    %32 = vector.extract_strided_slice %29 {offsets = [0, 64], sizes = [2, 32], strides = [1, 1]} : vector<2x128xf32> to vector<2x32xf32>
    %33 = vector.extract_strided_slice %28 {offsets = [0, 96], sizes = [2, 32], strides = [1, 1]} : vector<2x128xf32> to vector<2x32xf32>
    %34 = arith.mulf %31, %18 : vector<2x32xf32>
    %35 = arith.mulf %30, %32 : vector<2x32xf32>
    %36 = arith.addf %34, %35 : vector<2x32xf32>
    %37 = math.tanh %36 : vector<2x32xf32>
    %38 = arith.mulf %33, %37 : vector<2x32xf32>
    %39 = vector.extract_strided_slice %16 {offsets = [0, 1, 0], sizes = [2, 1, 128], strides = [1, 1, 1]} : vector<2x8x128xf32> to vector<2x1x128xf32>
    %40 = vector.shape_cast %39 : vector<2x1x128xf32> to vector<2x128xf32>
    %41 = arith.truncf %38 : vector<2x32xf32> to vector<2x32xbf16>
    %cst_12 = arith.constant dense<0.000000e+00> : vector<2x128xf32>
    %42 = tpu.matmul %41, %8, %cst_12 {dimension_numbers = #tpu.dot_dimension_numbers<[1], [0], [0], [1], [0, 0, 1, 1], [], []>} : vector<2x32xbf16>, vector<32x128xbf16>, vector<2x128xf32> -> vector<2x128xf32>
    %43 = arith.addf %40, %42 : vector<2x128xf32>
    %44 = arith.negf %43 : vector<2x128xf32>
    %45 = math.exp %44 : vector<2x128xf32>
    %cst_13 = arith.constant 1.000000e+00 : f32
    %46 = vector.broadcast %cst_13 : f32 to vector<2x128xf32>
    %47 = arith.addf %46, %45 : vector<2x128xf32>
    %48 = arith.divf %46, %47 : vector<2x128xf32>
    %49 = math.tanh %43 : vector<2x128xf32>
    %50 = vector.extract_strided_slice %48 {offsets = [0, 0], sizes = [2, 32], strides = [1, 1]} : vector<2x128xf32> to vector<2x32xf32>
    %51 = vector.extract_strided_slice %48 {offsets = [0, 32], sizes = [2, 32], strides = [1, 1]} : vector<2x128xf32> to vector<2x32xf32>
    %52 = vector.extract_strided_slice %49 {offsets = [0, 64], sizes = [2, 32], strides = [1, 1]} : vector<2x128xf32> to vector<2x32xf32>
    %53 = vector.extract_strided_slice %48 {offsets = [0, 96], sizes = [2, 32], strides = [1, 1]} : vector<2x128xf32> to vector<2x32xf32>
    %54 = arith.mulf %51, %36 : vector<2x32xf32>
    %55 = arith.mulf %50, %52 : vector<2x32xf32>
    %56 = arith.addf %54, %55 : vector<2x32xf32>
    %57 = math.tanh %56 : vector<2x32xf32>
    %58 = arith.mulf %53, %57 : vector<2x32xf32>
    %59 = vector.extract_strided_slice %16 {offsets = [0, 2, 0], sizes = [2, 1, 128], strides = [1, 1, 1]} : vector<2x8x128xf32> to vector<2x1x128xf32>
    %60 = vector.shape_cast %59 : vector<2x1x128xf32> to vector<2x128xf32>
    %61 = arith.truncf %58 : vector<2x32xf32> to vector<2x32xbf16>
    %cst_14 = arith.constant dense<0.000000e+00> : vector<2x128xf32>
    %62 = tpu.matmul %61, %8, %cst_14 {dimension_numbers = #tpu.dot_dimension_numbers<[1], [0], [0], [1], [0, 0, 1, 1], [], []>} : vector<2x32xbf16>, vector<32x128xbf16>, vector<2x128xf32> -> vector<2x128xf32>
    %63 = arith.addf %60, %62 : vector<2x128xf32>
    %64 = arith.negf %63 : vector<2x128xf32>
    %65 = math.exp %64 : vector<2x128xf32>
    %cst_15 = arith.constant 1.000000e+00 : f32
    %66 = vector.broadcast %cst_15 : f32 to vector<2x128xf32>
    %67 = arith.addf %66, %65 : vector<2x128xf32>
    %68 = arith.divf %66, %67 : vector<2x128xf32>
    %69 = math.tanh %63 : vector<2x128xf32>
    %70 = vector.extract_strided_slice %68 {offsets = [0, 0], sizes = [2, 32], strides = [1, 1]} : vector<2x128xf32> to vector<2x32xf32>
    %71 = vector.extract_strided_slice %68 {offsets = [0, 32], sizes = [2, 32], strides = [1, 1]} : vector<2x128xf32> to vector<2x32xf32>
    %72 = vector.extract_strided_slice %69 {offsets = [0, 64], sizes = [2, 32], strides = [1, 1]} : vector<2x128xf32> to vector<2x32xf32>
    %73 = vector.extract_strided_slice %68 {offsets = [0, 96], sizes = [2, 32], strides = [1, 1]} : vector<2x128xf32> to vector<2x32xf32>
    %74 = arith.mulf %71, %56 : vector<2x32xf32>
    %75 = arith.mulf %70, %72 : vector<2x32xf32>
    %76 = arith.addf %74, %75 : vector<2x32xf32>
    %77 = math.tanh %76 : vector<2x32xf32>
    %78 = arith.mulf %73, %77 : vector<2x32xf32>
    %79 = vector.extract_strided_slice %16 {offsets = [0, 3, 0], sizes = [2, 1, 128], strides = [1, 1, 1]} : vector<2x8x128xf32> to vector<2x1x128xf32>
    %80 = vector.shape_cast %79 : vector<2x1x128xf32> to vector<2x128xf32>
    %81 = arith.truncf %78 : vector<2x32xf32> to vector<2x32xbf16>
    %cst_16 = arith.constant dense<0.000000e+00> : vector<2x128xf32>
    %82 = tpu.matmul %81, %8, %cst_16 {dimension_numbers = #tpu.dot_dimension_numbers<[1], [0], [0], [1], [0, 0, 1, 1], [], []>} : vector<2x32xbf16>, vector<32x128xbf16>, vector<2x128xf32> -> vector<2x128xf32>
    %83 = arith.addf %80, %82 : vector<2x128xf32>
    %84 = arith.negf %83 : vector<2x128xf32>
    %85 = math.exp %84 : vector<2x128xf32>
    %cst_17 = arith.constant 1.000000e+00 : f32
    %86 = vector.broadcast %cst_17 : f32 to vector<2x128xf32>
    %87 = arith.addf %86, %85 : vector<2x128xf32>
    %88 = arith.divf %86, %87 : vector<2x128xf32>
    %89 = math.tanh %83 : vector<2x128xf32>
    %90 = vector.extract_strided_slice %88 {offsets = [0, 0], sizes = [2, 32], strides = [1, 1]} : vector<2x128xf32> to vector<2x32xf32>
    %91 = vector.extract_strided_slice %88 {offsets = [0, 32], sizes = [2, 32], strides = [1, 1]} : vector<2x128xf32> to vector<2x32xf32>
    %92 = vector.extract_strided_slice %89 {offsets = [0, 64], sizes = [2, 32], strides = [1, 1]} : vector<2x128xf32> to vector<2x32xf32>
    %93 = vector.extract_strided_slice %88 {offsets = [0, 96], sizes = [2, 32], strides = [1, 1]} : vector<2x128xf32> to vector<2x32xf32>
    %94 = arith.mulf %91, %76 : vector<2x32xf32>
    %95 = arith.mulf %90, %92 : vector<2x32xf32>
    %96 = arith.addf %94, %95 : vector<2x32xf32>
    %97 = math.tanh %96 : vector<2x32xf32>
    %98 = arith.mulf %93, %97 : vector<2x32xf32>
    %99 = vector.extract_strided_slice %16 {offsets = [0, 4, 0], sizes = [2, 1, 128], strides = [1, 1, 1]} : vector<2x8x128xf32> to vector<2x1x128xf32>
    %100 = vector.shape_cast %99 : vector<2x1x128xf32> to vector<2x128xf32>
    %101 = arith.truncf %98 : vector<2x32xf32> to vector<2x32xbf16>
    %cst_18 = arith.constant dense<0.000000e+00> : vector<2x128xf32>
    %102 = tpu.matmul %101, %8, %cst_18 {dimension_numbers = #tpu.dot_dimension_numbers<[1], [0], [0], [1], [0, 0, 1, 1], [], []>} : vector<2x32xbf16>, vector<32x128xbf16>, vector<2x128xf32> -> vector<2x128xf32>
    %103 = arith.addf %100, %102 : vector<2x128xf32>
    %104 = arith.negf %103 : vector<2x128xf32>
    %105 = math.exp %104 : vector<2x128xf32>
    %cst_19 = arith.constant 1.000000e+00 : f32
    %106 = vector.broadcast %cst_19 : f32 to vector<2x128xf32>
    %107 = arith.addf %106, %105 : vector<2x128xf32>
    %108 = arith.divf %106, %107 : vector<2x128xf32>
    %109 = math.tanh %103 : vector<2x128xf32>
    %110 = vector.extract_strided_slice %108 {offsets = [0, 0], sizes = [2, 32], strides = [1, 1]} : vector<2x128xf32> to vector<2x32xf32>
    %111 = vector.extract_strided_slice %108 {offsets = [0, 32], sizes = [2, 32], strides = [1, 1]} : vector<2x128xf32> to vector<2x32xf32>
    %112 = vector.extract_strided_slice %109 {offsets = [0, 64], sizes = [2, 32], strides = [1, 1]} : vector<2x128xf32> to vector<2x32xf32>
    %113 = vector.extract_strided_slice %108 {offsets = [0, 96], sizes = [2, 32], strides = [1, 1]} : vector<2x128xf32> to vector<2x32xf32>
    %114 = arith.mulf %111, %96 : vector<2x32xf32>
    %115 = arith.mulf %110, %112 : vector<2x32xf32>
    %116 = arith.addf %114, %115 : vector<2x32xf32>
    %117 = math.tanh %116 : vector<2x32xf32>
    %118 = arith.mulf %113, %117 : vector<2x32xf32>
    %119 = vector.extract_strided_slice %16 {offsets = [0, 5, 0], sizes = [2, 1, 128], strides = [1, 1, 1]} : vector<2x8x128xf32> to vector<2x1x128xf32>
    %120 = vector.shape_cast %119 : vector<2x1x128xf32> to vector<2x128xf32>
    %121 = arith.truncf %118 : vector<2x32xf32> to vector<2x32xbf16>
    %cst_20 = arith.constant dense<0.000000e+00> : vector<2x128xf32>
    %122 = tpu.matmul %121, %8, %cst_20 {dimension_numbers = #tpu.dot_dimension_numbers<[1], [0], [0], [1], [0, 0, 1, 1], [], []>} : vector<2x32xbf16>, vector<32x128xbf16>, vector<2x128xf32> -> vector<2x128xf32>
    %123 = arith.addf %120, %122 : vector<2x128xf32>
    %124 = arith.negf %123 : vector<2x128xf32>
    %125 = math.exp %124 : vector<2x128xf32>
    %cst_21 = arith.constant 1.000000e+00 : f32
    %126 = vector.broadcast %cst_21 : f32 to vector<2x128xf32>
    %127 = arith.addf %126, %125 : vector<2x128xf32>
    %128 = arith.divf %126, %127 : vector<2x128xf32>
    %129 = math.tanh %123 : vector<2x128xf32>
    %130 = vector.extract_strided_slice %128 {offsets = [0, 0], sizes = [2, 32], strides = [1, 1]} : vector<2x128xf32> to vector<2x32xf32>
    %131 = vector.extract_strided_slice %128 {offsets = [0, 32], sizes = [2, 32], strides = [1, 1]} : vector<2x128xf32> to vector<2x32xf32>
    %132 = vector.extract_strided_slice %129 {offsets = [0, 64], sizes = [2, 32], strides = [1, 1]} : vector<2x128xf32> to vector<2x32xf32>
    %133 = vector.extract_strided_slice %128 {offsets = [0, 96], sizes = [2, 32], strides = [1, 1]} : vector<2x128xf32> to vector<2x32xf32>
    %134 = arith.mulf %131, %116 : vector<2x32xf32>
    %135 = arith.mulf %130, %132 : vector<2x32xf32>
    %136 = arith.addf %134, %135 : vector<2x32xf32>
    %137 = math.tanh %136 : vector<2x32xf32>
    %138 = arith.mulf %133, %137 : vector<2x32xf32>
    %139 = vector.extract_strided_slice %16 {offsets = [0, 6, 0], sizes = [2, 1, 128], strides = [1, 1, 1]} : vector<2x8x128xf32> to vector<2x1x128xf32>
    %140 = vector.shape_cast %139 : vector<2x1x128xf32> to vector<2x128xf32>
    %141 = arith.truncf %138 : vector<2x32xf32> to vector<2x32xbf16>
    %cst_22 = arith.constant dense<0.000000e+00> : vector<2x128xf32>
    %142 = tpu.matmul %141, %8, %cst_22 {dimension_numbers = #tpu.dot_dimension_numbers<[1], [0], [0], [1], [0, 0, 1, 1], [], []>} : vector<2x32xbf16>, vector<32x128xbf16>, vector<2x128xf32> -> vector<2x128xf32>
    %143 = arith.addf %140, %142 : vector<2x128xf32>
    %144 = arith.negf %143 : vector<2x128xf32>
    %145 = math.exp %144 : vector<2x128xf32>
    %cst_23 = arith.constant 1.000000e+00 : f32
    %146 = vector.broadcast %cst_23 : f32 to vector<2x128xf32>
    %147 = arith.addf %146, %145 : vector<2x128xf32>
    %148 = arith.divf %146, %147 : vector<2x128xf32>
    %149 = math.tanh %143 : vector<2x128xf32>
    %150 = vector.extract_strided_slice %148 {offsets = [0, 0], sizes = [2, 32], strides = [1, 1]} : vector<2x128xf32> to vector<2x32xf32>
    %151 = vector.extract_strided_slice %148 {offsets = [0, 32], sizes = [2, 32], strides = [1, 1]} : vector<2x128xf32> to vector<2x32xf32>
    %152 = vector.extract_strided_slice %149 {offsets = [0, 64], sizes = [2, 32], strides = [1, 1]} : vector<2x128xf32> to vector<2x32xf32>
    %153 = vector.extract_strided_slice %148 {offsets = [0, 96], sizes = [2, 32], strides = [1, 1]} : vector<2x128xf32> to vector<2x32xf32>
    %154 = arith.mulf %151, %136 : vector<2x32xf32>
    %155 = arith.mulf %150, %152 : vector<2x32xf32>
    %156 = arith.addf %154, %155 : vector<2x32xf32>
    %157 = math.tanh %156 : vector<2x32xf32>
    %158 = arith.mulf %153, %157 : vector<2x32xf32>
    %159 = vector.extract_strided_slice %16 {offsets = [0, 7, 0], sizes = [2, 1, 128], strides = [1, 1, 1]} : vector<2x8x128xf32> to vector<2x1x128xf32>
    %160 = vector.shape_cast %159 : vector<2x1x128xf32> to vector<2x128xf32>
    %161 = arith.truncf %158 : vector<2x32xf32> to vector<2x32xbf16>
    %cst_24 = arith.constant dense<0.000000e+00> : vector<2x128xf32>
    %162 = tpu.matmul %161, %8, %cst_24 {dimension_numbers = #tpu.dot_dimension_numbers<[1], [0], [0], [1], [0, 0, 1, 1], [], []>} : vector<2x32xbf16>, vector<32x128xbf16>, vector<2x128xf32> -> vector<2x128xf32>
    %163 = arith.addf %160, %162 : vector<2x128xf32>
    %164 = arith.negf %163 : vector<2x128xf32>
    %165 = math.exp %164 : vector<2x128xf32>
    %cst_25 = arith.constant 1.000000e+00 : f32
    %166 = vector.broadcast %cst_25 : f32 to vector<2x128xf32>
    %167 = arith.addf %166, %165 : vector<2x128xf32>
    %168 = arith.divf %166, %167 : vector<2x128xf32>
    %169 = math.tanh %163 : vector<2x128xf32>
    %170 = vector.extract_strided_slice %168 {offsets = [0, 0], sizes = [2, 32], strides = [1, 1]} : vector<2x128xf32> to vector<2x32xf32>
    %171 = vector.extract_strided_slice %168 {offsets = [0, 32], sizes = [2, 32], strides = [1, 1]} : vector<2x128xf32> to vector<2x32xf32>
    %172 = vector.extract_strided_slice %169 {offsets = [0, 64], sizes = [2, 32], strides = [1, 1]} : vector<2x128xf32> to vector<2x32xf32>
    %173 = vector.extract_strided_slice %168 {offsets = [0, 96], sizes = [2, 32], strides = [1, 1]} : vector<2x128xf32> to vector<2x32xf32>
    %174 = arith.mulf %171, %156 : vector<2x32xf32>
    %175 = arith.mulf %170, %172 : vector<2x32xf32>
    %176 = arith.addf %174, %175 : vector<2x32xf32>
    %177 = math.tanh %176 : vector<2x32xf32>
    %178 = arith.mulf %173, %177 : vector<2x32xf32>
    %179 = vector.shape_cast %38 : vector<2x32xf32> to vector<2x1x32xf32>
    %180 = vector.shape_cast %58 : vector<2x32xf32> to vector<2x1x32xf32>
    %181 = vector.shape_cast %78 : vector<2x32xf32> to vector<2x1x32xf32>
    %182 = vector.shape_cast %98 : vector<2x32xf32> to vector<2x1x32xf32>
    %183 = vector.shape_cast %118 : vector<2x32xf32> to vector<2x1x32xf32>
    %184 = vector.shape_cast %138 : vector<2x32xf32> to vector<2x1x32xf32>
    %185 = vector.shape_cast %158 : vector<2x32xf32> to vector<2x1x32xf32>
    %186 = vector.shape_cast %178 : vector<2x32xf32> to vector<2x1x32xf32>
    %187 = tpu.concatenate %179, %180, %181, %182, %183, %184, %185, %186 in 1 : vector<2x1x32xf32>, vector<2x1x32xf32>, vector<2x1x32xf32>, vector<2x1x32xf32>, vector<2x1x32xf32>, vector<2x1x32xf32>, vector<2x1x32xf32>, vector<2x1x32xf32> -> vector<2x8x32xf32>
    %188 = vector.shape_cast %187 : vector<2x8x32xf32> to vector<16x32xf32>
    %189 = arith.truncf %188 : vector<16x32xf32> to vector<16x32xbf16>
    %cst_26 = arith.constant dense<0.000000e+00> : vector<16x128xf32>
    %190 = tpu.matmul %189, %9, %cst_26 {dimension_numbers = #tpu.dot_dimension_numbers<[1], [0], [0], [1], [0, 0, 1, 1], [], []>} : vector<16x32xbf16>, vector<32x128xbf16>, vector<16x128xf32> -> vector<16x128xf32>
    %191 = vector.broadcast %2 : vector<1x128xf32> to vector<16x128xf32>
    %192 = arith.addf %190, %191 : vector<16x128xf32>
    %193 = vector.shape_cast %192 : vector<16x128xf32> to vector<2x8x128xf32>
    %cst_27 = arith.constant 0.000000e+00 : f32
    %194 = vector.broadcast %cst_27 : f32 to vector<2x32xf32>
    %cst_28 = arith.constant 0.000000e+00 : f32
    %195 = vector.broadcast %cst_28 : f32 to vector<2x32xf32>
    %196 = vector.extract_strided_slice %193 {offsets = [0, 0, 0], sizes = [2, 1, 128], strides = [1, 1, 1]} : vector<2x8x128xf32> to vector<2x1x128xf32>
    %197 = vector.shape_cast %196 : vector<2x1x128xf32> to vector<2x128xf32>
    %198 = arith.truncf %194 : vector<2x32xf32> to vector<2x32xbf16>
    %cst_29 = arith.constant dense<0.000000e+00> : vector<2x128xf32>
    %199 = tpu.matmul %198, %10, %cst_29 {dimension_numbers = #tpu.dot_dimension_numbers<[1], [0], [0], [1], [0, 0, 1, 1], [], []>} : vector<2x32xbf16>, vector<32x128xbf16>, vector<2x128xf32> -> vector<2x128xf32>
    %200 = arith.addf %197, %199 : vector<2x128xf32>
    %201 = arith.negf %200 : vector<2x128xf32>
    %202 = math.exp %201 : vector<2x128xf32>
    %cst_30 = arith.constant 1.000000e+00 : f32
    %203 = vector.broadcast %cst_30 : f32 to vector<2x128xf32>
    %204 = arith.addf %203, %202 : vector<2x128xf32>
    %205 = arith.divf %203, %204 : vector<2x128xf32>
    %206 = math.tanh %200 : vector<2x128xf32>
    %207 = vector.extract_strided_slice %205 {offsets = [0, 0], sizes = [2, 32], strides = [1, 1]} : vector<2x128xf32> to vector<2x32xf32>
    %208 = vector.extract_strided_slice %205 {offsets = [0, 32], sizes = [2, 32], strides = [1, 1]} : vector<2x128xf32> to vector<2x32xf32>
    %209 = vector.extract_strided_slice %206 {offsets = [0, 64], sizes = [2, 32], strides = [1, 1]} : vector<2x128xf32> to vector<2x32xf32>
    %210 = vector.extract_strided_slice %205 {offsets = [0, 96], sizes = [2, 32], strides = [1, 1]} : vector<2x128xf32> to vector<2x32xf32>
    %211 = arith.mulf %208, %195 : vector<2x32xf32>
    %212 = arith.mulf %207, %209 : vector<2x32xf32>
    %213 = arith.addf %211, %212 : vector<2x32xf32>
    %214 = math.tanh %213 : vector<2x32xf32>
    %215 = arith.mulf %210, %214 : vector<2x32xf32>
    %216 = vector.extract_strided_slice %193 {offsets = [0, 1, 0], sizes = [2, 1, 128], strides = [1, 1, 1]} : vector<2x8x128xf32> to vector<2x1x128xf32>
    %217 = vector.shape_cast %216 : vector<2x1x128xf32> to vector<2x128xf32>
    %218 = arith.truncf %215 : vector<2x32xf32> to vector<2x32xbf16>
    %cst_31 = arith.constant dense<0.000000e+00> : vector<2x128xf32>
    %219 = tpu.matmul %218, %10, %cst_31 {dimension_numbers = #tpu.dot_dimension_numbers<[1], [0], [0], [1], [0, 0, 1, 1], [], []>} : vector<2x32xbf16>, vector<32x128xbf16>, vector<2x128xf32> -> vector<2x128xf32>
    %220 = arith.addf %217, %219 : vector<2x128xf32>
    %221 = arith.negf %220 : vector<2x128xf32>
    %222 = math.exp %221 : vector<2x128xf32>
    %cst_32 = arith.constant 1.000000e+00 : f32
    %223 = vector.broadcast %cst_32 : f32 to vector<2x128xf32>
    %224 = arith.addf %223, %222 : vector<2x128xf32>
    %225 = arith.divf %223, %224 : vector<2x128xf32>
    %226 = math.tanh %220 : vector<2x128xf32>
    %227 = vector.extract_strided_slice %225 {offsets = [0, 0], sizes = [2, 32], strides = [1, 1]} : vector<2x128xf32> to vector<2x32xf32>
    %228 = vector.extract_strided_slice %225 {offsets = [0, 32], sizes = [2, 32], strides = [1, 1]} : vector<2x128xf32> to vector<2x32xf32>
    %229 = vector.extract_strided_slice %226 {offsets = [0, 64], sizes = [2, 32], strides = [1, 1]} : vector<2x128xf32> to vector<2x32xf32>
    %230 = vector.extract_strided_slice %225 {offsets = [0, 96], sizes = [2, 32], strides = [1, 1]} : vector<2x128xf32> to vector<2x32xf32>
    %231 = arith.mulf %228, %213 : vector<2x32xf32>
    %232 = arith.mulf %227, %229 : vector<2x32xf32>
    %233 = arith.addf %231, %232 : vector<2x32xf32>
    %234 = math.tanh %233 : vector<2x32xf32>
    %235 = arith.mulf %230, %234 : vector<2x32xf32>
    %236 = vector.extract_strided_slice %193 {offsets = [0, 2, 0], sizes = [2, 1, 128], strides = [1, 1, 1]} : vector<2x8x128xf32> to vector<2x1x128xf32>
    %237 = vector.shape_cast %236 : vector<2x1x128xf32> to vector<2x128xf32>
    %238 = arith.truncf %235 : vector<2x32xf32> to vector<2x32xbf16>
    %cst_33 = arith.constant dense<0.000000e+00> : vector<2x128xf32>
    %239 = tpu.matmul %238, %10, %cst_33 {dimension_numbers = #tpu.dot_dimension_numbers<[1], [0], [0], [1], [0, 0, 1, 1], [], []>} : vector<2x32xbf16>, vector<32x128xbf16>, vector<2x128xf32> -> vector<2x128xf32>
    %240 = arith.addf %237, %239 : vector<2x128xf32>
    %241 = arith.negf %240 : vector<2x128xf32>
    %242 = math.exp %241 : vector<2x128xf32>
    %cst_34 = arith.constant 1.000000e+00 : f32
    %243 = vector.broadcast %cst_34 : f32 to vector<2x128xf32>
    %244 = arith.addf %243, %242 : vector<2x128xf32>
    %245 = arith.divf %243, %244 : vector<2x128xf32>
    %246 = math.tanh %240 : vector<2x128xf32>
    %247 = vector.extract_strided_slice %245 {offsets = [0, 0], sizes = [2, 32], strides = [1, 1]} : vector<2x128xf32> to vector<2x32xf32>
    %248 = vector.extract_strided_slice %245 {offsets = [0, 32], sizes = [2, 32], strides = [1, 1]} : vector<2x128xf32> to vector<2x32xf32>
    %249 = vector.extract_strided_slice %246 {offsets = [0, 64], sizes = [2, 32], strides = [1, 1]} : vector<2x128xf32> to vector<2x32xf32>
    %250 = vector.extract_strided_slice %245 {offsets = [0, 96], sizes = [2, 32], strides = [1, 1]} : vector<2x128xf32> to vector<2x32xf32>
    %251 = arith.mulf %248, %233 : vector<2x32xf32>
    %252 = arith.mulf %247, %249 : vector<2x32xf32>
    %253 = arith.addf %251, %252 : vector<2x32xf32>
    %254 = math.tanh %253 : vector<2x32xf32>
    %255 = arith.mulf %250, %254 : vector<2x32xf32>
    %256 = vector.extract_strided_slice %193 {offsets = [0, 3, 0], sizes = [2, 1, 128], strides = [1, 1, 1]} : vector<2x8x128xf32> to vector<2x1x128xf32>
    %257 = vector.shape_cast %256 : vector<2x1x128xf32> to vector<2x128xf32>
    %258 = arith.truncf %255 : vector<2x32xf32> to vector<2x32xbf16>
    %cst_35 = arith.constant dense<0.000000e+00> : vector<2x128xf32>
    %259 = tpu.matmul %258, %10, %cst_35 {dimension_numbers = #tpu.dot_dimension_numbers<[1], [0], [0], [1], [0, 0, 1, 1], [], []>} : vector<2x32xbf16>, vector<32x128xbf16>, vector<2x128xf32> -> vector<2x128xf32>
    %260 = arith.addf %257, %259 : vector<2x128xf32>
    %261 = arith.negf %260 : vector<2x128xf32>
    %262 = math.exp %261 : vector<2x128xf32>
    %cst_36 = arith.constant 1.000000e+00 : f32
    %263 = vector.broadcast %cst_36 : f32 to vector<2x128xf32>
    %264 = arith.addf %263, %262 : vector<2x128xf32>
    %265 = arith.divf %263, %264 : vector<2x128xf32>
    %266 = math.tanh %260 : vector<2x128xf32>
    %267 = vector.extract_strided_slice %265 {offsets = [0, 0], sizes = [2, 32], strides = [1, 1]} : vector<2x128xf32> to vector<2x32xf32>
    %268 = vector.extract_strided_slice %265 {offsets = [0, 32], sizes = [2, 32], strides = [1, 1]} : vector<2x128xf32> to vector<2x32xf32>
    %269 = vector.extract_strided_slice %266 {offsets = [0, 64], sizes = [2, 32], strides = [1, 1]} : vector<2x128xf32> to vector<2x32xf32>
    %270 = vector.extract_strided_slice %265 {offsets = [0, 96], sizes = [2, 32], strides = [1, 1]} : vector<2x128xf32> to vector<2x32xf32>
    %271 = arith.mulf %268, %253 : vector<2x32xf32>
    %272 = arith.mulf %267, %269 : vector<2x32xf32>
    %273 = arith.addf %271, %272 : vector<2x32xf32>
    %274 = math.tanh %273 : vector<2x32xf32>
    %275 = arith.mulf %270, %274 : vector<2x32xf32>
    %276 = vector.extract_strided_slice %193 {offsets = [0, 4, 0], sizes = [2, 1, 128], strides = [1, 1, 1]} : vector<2x8x128xf32> to vector<2x1x128xf32>
    %277 = vector.shape_cast %276 : vector<2x1x128xf32> to vector<2x128xf32>
    %278 = arith.truncf %275 : vector<2x32xf32> to vector<2x32xbf16>
    %cst_37 = arith.constant dense<0.000000e+00> : vector<2x128xf32>
    %279 = tpu.matmul %278, %10, %cst_37 {dimension_numbers = #tpu.dot_dimension_numbers<[1], [0], [0], [1], [0, 0, 1, 1], [], []>} : vector<2x32xbf16>, vector<32x128xbf16>, vector<2x128xf32> -> vector<2x128xf32>
    %280 = arith.addf %277, %279 : vector<2x128xf32>
    %281 = arith.negf %280 : vector<2x128xf32>
    %282 = math.exp %281 : vector<2x128xf32>
    %cst_38 = arith.constant 1.000000e+00 : f32
    %283 = vector.broadcast %cst_38 : f32 to vector<2x128xf32>
    %284 = arith.addf %283, %282 : vector<2x128xf32>
    %285 = arith.divf %283, %284 : vector<2x128xf32>
    %286 = math.tanh %280 : vector<2x128xf32>
    %287 = vector.extract_strided_slice %285 {offsets = [0, 0], sizes = [2, 32], strides = [1, 1]} : vector<2x128xf32> to vector<2x32xf32>
    %288 = vector.extract_strided_slice %285 {offsets = [0, 32], sizes = [2, 32], strides = [1, 1]} : vector<2x128xf32> to vector<2x32xf32>
    %289 = vector.extract_strided_slice %286 {offsets = [0, 64], sizes = [2, 32], strides = [1, 1]} : vector<2x128xf32> to vector<2x32xf32>
    %290 = vector.extract_strided_slice %285 {offsets = [0, 96], sizes = [2, 32], strides = [1, 1]} : vector<2x128xf32> to vector<2x32xf32>
    %291 = arith.mulf %288, %273 : vector<2x32xf32>
    %292 = arith.mulf %287, %289 : vector<2x32xf32>
    %293 = arith.addf %291, %292 : vector<2x32xf32>
    %294 = math.tanh %293 : vector<2x32xf32>
    %295 = arith.mulf %290, %294 : vector<2x32xf32>
    %296 = vector.extract_strided_slice %193 {offsets = [0, 5, 0], sizes = [2, 1, 128], strides = [1, 1, 1]} : vector<2x8x128xf32> to vector<2x1x128xf32>
    %297 = vector.shape_cast %296 : vector<2x1x128xf32> to vector<2x128xf32>
    %298 = arith.truncf %295 : vector<2x32xf32> to vector<2x32xbf16>
    %cst_39 = arith.constant dense<0.000000e+00> : vector<2x128xf32>
    %299 = tpu.matmul %298, %10, %cst_39 {dimension_numbers = #tpu.dot_dimension_numbers<[1], [0], [0], [1], [0, 0, 1, 1], [], []>} : vector<2x32xbf16>, vector<32x128xbf16>, vector<2x128xf32> -> vector<2x128xf32>
    %300 = arith.addf %297, %299 : vector<2x128xf32>
    %301 = arith.negf %300 : vector<2x128xf32>
    %302 = math.exp %301 : vector<2x128xf32>
    %cst_40 = arith.constant 1.000000e+00 : f32
    %303 = vector.broadcast %cst_40 : f32 to vector<2x128xf32>
    %304 = arith.addf %303, %302 : vector<2x128xf32>
    %305 = arith.divf %303, %304 : vector<2x128xf32>
    %306 = math.tanh %300 : vector<2x128xf32>
    %307 = vector.extract_strided_slice %305 {offsets = [0, 0], sizes = [2, 32], strides = [1, 1]} : vector<2x128xf32> to vector<2x32xf32>
    %308 = vector.extract_strided_slice %305 {offsets = [0, 32], sizes = [2, 32], strides = [1, 1]} : vector<2x128xf32> to vector<2x32xf32>
    %309 = vector.extract_strided_slice %306 {offsets = [0, 64], sizes = [2, 32], strides = [1, 1]} : vector<2x128xf32> to vector<2x32xf32>
    %310 = vector.extract_strided_slice %305 {offsets = [0, 96], sizes = [2, 32], strides = [1, 1]} : vector<2x128xf32> to vector<2x32xf32>
    %311 = arith.mulf %308, %293 : vector<2x32xf32>
    %312 = arith.mulf %307, %309 : vector<2x32xf32>
    %313 = arith.addf %311, %312 : vector<2x32xf32>
    %314 = math.tanh %313 : vector<2x32xf32>
    %315 = arith.mulf %310, %314 : vector<2x32xf32>
    %316 = vector.extract_strided_slice %193 {offsets = [0, 6, 0], sizes = [2, 1, 128], strides = [1, 1, 1]} : vector<2x8x128xf32> to vector<2x1x128xf32>
    %317 = vector.shape_cast %316 : vector<2x1x128xf32> to vector<2x128xf32>
    %318 = arith.truncf %315 : vector<2x32xf32> to vector<2x32xbf16>
    %cst_41 = arith.constant dense<0.000000e+00> : vector<2x128xf32>
    %319 = tpu.matmul %318, %10, %cst_41 {dimension_numbers = #tpu.dot_dimension_numbers<[1], [0], [0], [1], [0, 0, 1, 1], [], []>} : vector<2x32xbf16>, vector<32x128xbf16>, vector<2x128xf32> -> vector<2x128xf32>
    %320 = arith.addf %317, %319 : vector<2x128xf32>
    %321 = arith.negf %320 : vector<2x128xf32>
    %322 = math.exp %321 : vector<2x128xf32>
    %cst_42 = arith.constant 1.000000e+00 : f32
    %323 = vector.broadcast %cst_42 : f32 to vector<2x128xf32>
    %324 = arith.addf %323, %322 : vector<2x128xf32>
    %325 = arith.divf %323, %324 : vector<2x128xf32>
    %326 = math.tanh %320 : vector<2x128xf32>
    %327 = vector.extract_strided_slice %325 {offsets = [0, 0], sizes = [2, 32], strides = [1, 1]} : vector<2x128xf32> to vector<2x32xf32>
    %328 = vector.extract_strided_slice %325 {offsets = [0, 32], sizes = [2, 32], strides = [1, 1]} : vector<2x128xf32> to vector<2x32xf32>
    %329 = vector.extract_strided_slice %326 {offsets = [0, 64], sizes = [2, 32], strides = [1, 1]} : vector<2x128xf32> to vector<2x32xf32>
    %330 = vector.extract_strided_slice %325 {offsets = [0, 96], sizes = [2, 32], strides = [1, 1]} : vector<2x128xf32> to vector<2x32xf32>
    %331 = arith.mulf %328, %313 : vector<2x32xf32>
    %332 = arith.mulf %327, %329 : vector<2x32xf32>
    %333 = arith.addf %331, %332 : vector<2x32xf32>
    %334 = math.tanh %333 : vector<2x32xf32>
    %335 = arith.mulf %330, %334 : vector<2x32xf32>
    %336 = vector.extract_strided_slice %193 {offsets = [0, 7, 0], sizes = [2, 1, 128], strides = [1, 1, 1]} : vector<2x8x128xf32> to vector<2x1x128xf32>
    %337 = vector.shape_cast %336 : vector<2x1x128xf32> to vector<2x128xf32>
    %338 = arith.truncf %335 : vector<2x32xf32> to vector<2x32xbf16>
    %cst_43 = arith.constant dense<0.000000e+00> : vector<2x128xf32>
    %339 = tpu.matmul %338, %10, %cst_43 {dimension_numbers = #tpu.dot_dimension_numbers<[1], [0], [0], [1], [0, 0, 1, 1], [], []>} : vector<2x32xbf16>, vector<32x128xbf16>, vector<2x128xf32> -> vector<2x128xf32>
    %340 = arith.addf %337, %339 : vector<2x128xf32>
    %341 = arith.negf %340 : vector<2x128xf32>
    %342 = math.exp %341 : vector<2x128xf32>
    %cst_44 = arith.constant 1.000000e+00 : f32
    %343 = vector.broadcast %cst_44 : f32 to vector<2x128xf32>
    %344 = arith.addf %343, %342 : vector<2x128xf32>
    %345 = arith.divf %343, %344 : vector<2x128xf32>
    %346 = math.tanh %340 : vector<2x128xf32>
    %347 = vector.extract_strided_slice %345 {offsets = [0, 0], sizes = [2, 32], strides = [1, 1]} : vector<2x128xf32> to vector<2x32xf32>
    %348 = vector.extract_strided_slice %345 {offsets = [0, 32], sizes = [2, 32], strides = [1, 1]} : vector<2x128xf32> to vector<2x32xf32>
    %349 = vector.extract_strided_slice %346 {offsets = [0, 64], sizes = [2, 32], strides = [1, 1]} : vector<2x128xf32> to vector<2x32xf32>
    %350 = vector.extract_strided_slice %345 {offsets = [0, 96], sizes = [2, 32], strides = [1, 1]} : vector<2x128xf32> to vector<2x32xf32>
    %351 = arith.mulf %348, %333 : vector<2x32xf32>
    %352 = arith.mulf %347, %349 : vector<2x32xf32>
    %353 = arith.addf %351, %352 : vector<2x32xf32>
    %354 = math.tanh %353 : vector<2x32xf32>
    %355 = arith.mulf %350, %354 : vector<2x32xf32>
    %c0_45 = arith.constant 0 : index
    %c0_46 = arith.constant 0 : index
    %356 = vector.load %arg3[%c0_45, %c0_46] : memref<320x192xbf16, #tpu.memory_space<vmem>>, vector<32x192xbf16>
    %c32 = arith.constant 32 : index
    %c0_47 = arith.constant 0 : index
    %357 = vector.load %arg3[%c32, %c0_47] : memref<320x192xbf16, #tpu.memory_space<vmem>>, vector<4x192xbf16>
    %c0_48 = arith.constant 0 : index
    %c0_49 = arith.constant 0 : index
    %358 = vector.load %arg1[%c0_48, %c0_49] : memref<2x4xf32, #tpu.memory_space<vmem>>, vector<2x4xf32>
    %359 = arith.truncf %358 : vector<2x4xf32> to vector<2x4xbf16>
    %cst_50 = arith.constant dense<0.000000e+00> : vector<2x192xf32>
    %360 = tpu.matmul %359, %357, %cst_50 {dimension_numbers = #tpu.dot_dimension_numbers<[1], [0], [0], [1], [0, 0, 1, 1], [], []>} : vector<2x4xbf16>, vector<4x192xbf16>, vector<2x192xf32> -> vector<2x192xf32>
    %361 = vector.broadcast %3 : vector<1x192xf32> to vector<2x192xf32>
    %362 = arith.addf %360, %361 : vector<2x192xf32>
    %363 = arith.truncf %355 : vector<2x32xf32> to vector<2x32xbf16>
    %cst_51 = arith.constant dense<0.000000e+00> : vector<2x192xf32>
    %364 = tpu.matmul %363, %356, %cst_51 {dimension_numbers = #tpu.dot_dimension_numbers<[1], [0], [0], [1], [0, 0, 1, 1], [], []>} : vector<2x32xbf16>, vector<32x192xbf16>, vector<2x192xf32> -> vector<2x192xf32>
    %365 = arith.addf %364, %362 : vector<2x192xf32>
    %cst_52 = arith.constant 0.000000e+00 : f32
    %366 = vector.broadcast %cst_52 : f32 to vector<2x192xf32>
    %367 = arith.cmpf ogt, %365, %366 : vector<2x192xf32>
    %cst_53 = arith.constant 0.00999999977 : f32
    %368 = vector.broadcast %cst_53 : f32 to vector<2x192xf32>
    %369 = arith.mulf %368, %365 : vector<2x192xf32>
    %370 = arith.select %367, %365, %369 : vector<2x192xi1>, vector<2x192xf32>
    %c48_54 = arith.constant 48 : index
    %c0_55 = arith.constant 0 : index
    %371 = vector.load %arg3[%c48_54, %c0_55] : memref<320x192xbf16, #tpu.memory_space<vmem>>, vector<192x192xbf16>
    %372 = arith.truncf %370 : vector<2x192xf32> to vector<2x192xbf16>
    %cst_56 = arith.constant dense<0.000000e+00> : vector<2x192xf32>
    %373 = tpu.matmul %372, %371, %cst_56 {dimension_numbers = #tpu.dot_dimension_numbers<[1], [0], [0], [1], [0, 0, 1, 1], [], []>} : vector<2x192xbf16>, vector<192x192xbf16>, vector<2x192xf32> -> vector<2x192xf32>
    %374 = vector.broadcast %4 : vector<1x192xf32> to vector<2x192xf32>
    %375 = arith.addf %373, %374 : vector<2x192xf32>
    %376 = vector.extract_strided_slice %375 {offsets = [0, 32], sizes = [2, 16], strides = [1, 1]} : vector<2x192xf32> to vector<2x16xf32>
    %cst_57 = arith.constant 0.000000e+00 : f32
    %377 = vector.broadcast %cst_57 : f32 to vector<2x192xf32>
    %378 = arith.cmpf ogt, %375, %377 : vector<2x192xf32>
    %cst_58 = arith.constant 0.00999999977 : f32
    %379 = vector.broadcast %cst_58 : f32 to vector<2x192xf32>
    %380 = arith.mulf %379, %375 : vector<2x192xf32>
    %381 = arith.select %378, %375, %380 : vector<2x192xi1>, vector<2x192xf32>
    %382 = vector.extract_strided_slice %381 {offsets = [0, 0], sizes = [2, 56], strides = [1, 1]} : vector<2x192xf32> to vector<2x56xf32>
    %c240 = arith.constant 240 : index
    %c0_59 = arith.constant 0 : index
    %383 = vector.load %arg3[%c240, %c0_59] : memref<320x192xbf16, #tpu.memory_space<vmem>>, vector<56x192xbf16>
    %384 = arith.truncf %382 : vector<2x56xf32> to vector<2x56xbf16>
    %cst_60 = arith.constant dense<0.000000e+00> : vector<2x192xf32>
    %385 = tpu.matmul %384, %383, %cst_60 {dimension_numbers = #tpu.dot_dimension_numbers<[1], [0], [0], [1], [0, 0, 1, 1], [], []>} : vector<2x56xbf16>, vector<56x192xbf16>, vector<2x192xf32> -> vector<2x192xf32>
    %386 = vector.broadcast %5 : vector<1x192xf32> to vector<2x192xf32>
    %387 = arith.addf %385, %386 : vector<2x192xf32>
    %388 = vector.extract_strided_slice %387 {offsets = [0, 16], sizes = [2, 1], strides = [1, 1]} : vector<2x192xf32> to vector<2x1xf32>
    %389 = vector.extract_strided_slice %387 {offsets = [0, 0], sizes = [2, 16], strides = [1, 1]} : vector<2x192xf32> to vector<2x16xf32>
    %cst_61 = arith.constant 0.000000e+00 : f32
    %390 = vector.broadcast %cst_61 : f32 to vector<2x16xf32>
    %391 = arith.cmpf ogt, %389, %390 : vector<2x16xf32>
    %cst_62 = arith.constant 0.00999999977 : f32
    %392 = vector.broadcast %cst_62 : f32 to vector<2x16xf32>
    %393 = arith.mulf %392, %389 : vector<2x16xf32>
    %394 = arith.select %391, %389, %393 : vector<2x16xi1>, vector<2x16xf32>
    %c304 = arith.constant 304 : index
    %c0_63 = arith.constant 0 : index
    %395 = vector.load %arg3[%c304, %c0_63] : memref<320x192xbf16, #tpu.memory_space<vmem>>, vector<16x192xbf16>
    %396 = arith.truncf %394 : vector<2x16xf32> to vector<2x16xbf16>
    %cst_64 = arith.constant dense<0.000000e+00> : vector<2x192xf32>
    %397 = tpu.matmul %396, %395, %cst_64 {dimension_numbers = #tpu.dot_dimension_numbers<[1], [0], [0], [1], [0, 0, 1, 1], [], []>} : vector<2x16xbf16>, vector<16x192xbf16>, vector<2x192xf32> -> vector<2x192xf32>
    %398 = vector.broadcast %6 : vector<1x192xf32> to vector<2x192xf32>
    %399 = arith.addf %397, %398 : vector<2x192xf32>
    %400 = vector.extract_strided_slice %399 {offsets = [0, 0], sizes = [2, 4], strides = [1, 1]} : vector<2x192xf32> to vector<2x4xf32>
    %cst_65 = arith.constant dense<0xFF800000> : vector<2xf32>
    %401 = vector.multi_reduction <maximumf>, %400, %cst_65 [1] : vector<2x4xf32> to vector<2xf32>
    %402 = vector.shape_cast %401 : vector<2xf32> to vector<2x1xf32>
    %403 = vector.broadcast %402 : vector<2x1xf32> to vector<2x4xf32>
    %404 = arith.subf %400, %403 : vector<2x4xf32>
    %405 = math.exp %404 : vector<2x4xf32>
    %cst_66 = arith.constant dense<0.000000e+00> : vector<2xf32>
    %406 = vector.multi_reduction <add>, %405, %cst_66 [1] : vector<2x4xf32> to vector<2xf32>
    %407 = vector.shape_cast %406 : vector<2xf32> to vector<2x1xf32>
    %408 = vector.broadcast %407 : vector<2x1xf32> to vector<2x4xf32>
    %409 = arith.divf %405, %408 : vector<2x4xf32>
    %cst_67 = arith.constant 0.000000e+00 : f32
    %410 = vector.broadcast %cst_67 : f32 to vector<2x107xf32>
    %411 = tpu.concatenate %409, %376, %388, %410 in 1 : vector<2x4xf32>, vector<2x16xf32>, vector<2x1xf32>, vector<2x107xf32> -> vector<2x128xf32>
    %c0_68 = arith.constant 0 : index
    %c0_69 = arith.constant 0 : index
    %412 = vector.load %arg5[%c0_68, %c0_69] : memref<2x128xf32, #tpu.memory_space<vmem>>, vector<2x128xf32>
    tpu.vector_store %arg5[%c0_68, %c0_69], %411 {strides = array<i32>} : memref<2x128xf32, #tpu.memory_space<vmem>>, vector<2x128xf32>,
    return
  }
}

</mosaic_0001>

<bundles_post_ra>
// kernel: lstm_dqn_forward.1
= control target key start
LH: loop header
LB: loop body
LE: loop exit
PB: predicated region body
PF: predicated region fallthrough
CT: control target
= control target key end

     0   :  { %v3192_v0 = vmov 0.0   ;;  %vm3193_vm0 = vmmov 0   ;;  %vm50_vm1 = vcmask 130048   ;;  %v3194_v7 = vmov 0   ;;  %s3195_s29 = smov 64   ;;  %s3196_s30 = smov 32   ;;  %s3810_s2 = inlined_call_operand.vmem [shape: bf16[112,128], index: 2, kind: input, shape index: {}]   ;;  %s3811_s0 = inlined_call_operand.vmem [shape: f32[16,16], index: 0, kind: input, shape index: {}]   ;;  %s3812_s4 = inlined_call_operand.vmem [shape: f32[8,192], index: 4, kind: input, shape index: {}]   ;;  %s3813_s3 = inlined_call_operand.vmem [shape: bf16[320,192], index: 3, kind: input, shape index: {}]   ;;  %s3814_s1 = inlined_call_operand.vmem [shape: f32[2,4], index: 1, kind: input, shape index: {}]   ;;  %s3815_s5 = inlined_call_operand.vmem [shape: f32[2,128], index: 5, kind: output, shape index: {}]  }
   0x1   :  { %2710 = vmatprep.subr.bf16.mxu0 %v3192_v0  ;;  %v2865_v1 = vld [vmem:[%s3810_s2] sm:$0xff]   ;;  %2712 = vmatprep.mubr.msk.bf16.mxu0 %vm3193_vm0, %v3192_v0  ;;  %v38_v3 = vld [vmem:[%s3811_s0 + $0x8] sm:$0xff]  ;;  %v3253_v6 = vld [vmem:[%s3810_s2 + $0x10] sm:$0xff]   ;;  %v40_v8 = vlaneseq  ;;  %vm212_vm2 = vcmask 1041409   ;;  %vm107_vm3 = vcmask 261120   ;;  %vm1015_vm4 = vcmask 1040384  }
   0x2   :  { %v37_v2 = vld [vmem:[%s3811_s0] sm:$0xff]  ;;  %2732 = vmatprep.subr.bf16.mxu1 %v3192_v0  ;;  %2736 = vmatprep.mubr.msk.bf16.mxu1 %vm3193_vm0, %v3192_v0  ;;  %v3247_v5 = vld [vmem:[%s3810_s2 + $0x8] sm:$0xff]   ;;  %vm1018_vm5 = vcmask 1041408   ;;  %vm1021_vm6 = vcmask 1042432   ;;  %vm1024_vm7 = vcmask 1043456   ;;  %vm1027_vm8 = vcmask 1044480  }
   0x3   :  { %2711 = vmatpush3.bf16.msra.mxu0 %v2865_v1  ;;  %v39_v4 = vpack.c.bf16 %v38_v3, %v37_v2  ;;  %2733 = vmatpush3.bf16.msra.mxu1 %v3247_v5  ;;  %v3273_v9 = vshrl.u32 %v40_v8, 7  ;;  %v21_v15 = vld [vmem:[%s3812_s4] sm:$0xff]  ;;  %vm1030_vm9 = vcmask 1045504   ;;  %vm1033_vm10 = vcmask 1046528  }
   0x4   :  { %2716 = vmatprep.subr.bf16.mxu0 %v3192_v0  ;;  %2734 = vmatprep.subr.bf16.mxu1 %v3192_v0  ;;  %vm2035_vm11 = vcmask 31744   ;;  %vm2318_vm14 = vcmask 523264  }
   0x5   :  { %v42_v13 = vsub.s32 0, %v3273_v9 }
   0x6   :  { %2713 = vmatmul.mubr.msk.bf16.vlgmr.msra.gmra.mrb[0].mxu0 %vm50_vm1, %v39_v4 }
   0x7   :  { %2717 = vmatpush3.bf16.msra.mxu0 %v3247_v5  ;;  %2720 = vmatprep.mubr.msk.bf16.mxu0 %vm3193_vm0, %v3192_v0  ;;  %v43_v16 = vrot.slane %v21_v15, %v42_v13 }
   0x8   :  { %2718 = vmatprep.subr.bf16.mxu0 %v3192_v0  ;;  %2735 = vmatpush3.bf16.msra.mxu1 %v3253_v6 }
   0x9   :  { %2748 = vmatprep.subr.bf16.mxu1 %v3192_v0 }
   0xb   :  { %2719 = vmatpush3.bf16.msra.mxu0 %v3253_v6 }
   0xc   :  { %2724 = vmatprep.subr.bf16.mxu0 %v3192_v0 }
   0xe   :  { %2721 = vmatmul.mubr.bf16.vlgmr.msra.gmra.mrb[4].mxu0 %v3194_v7 }
   0xf   :  { %2725 = vmatpush3.bf16.msra.mxu0 %v3247_v5  ;;  %2728 = vmatprep.mubr.msk.bf16.mxu0 %vm3193_vm0, %v3192_v0 }
  0x10   :  { %2726 = vmatprep.subr.bf16.mxu0 %v3192_v0 }
  0x13   :  { %2727 = vmatpush3.bf16.msra.mxu0 %v3253_v6 }
  0x14   :  { %2740 = vmatprep.subr.bf16.mxu0 %v3192_v0 }
  0xd9   :  { %v88_v10 = vpop.f32.mrb[0].mxu0 }
  0xda   :  { %v2714_v11 = vpop.f32.mrb[1].mxu0  ;;  %v3282_v24 = vadd.f32 %v88_v10, %v43_v16 }
  0xdb   :  { %v91_v12 = vpop.f32.mrb[2].mxu0 }
  0xdc   :  { %v2715_v14 = vpop.f32.mrb[3].mxu0  ;;  %v3279_v18 = vadd.f32 %v91_v12, %v43_v16 }
  0xe1   :  { %v145_v17 = vpop.f32.mrb[4].mxu0 }
  0xe2   :  { %v152_v19 = vrot.slane %v145_v17, 1  ;;  %v2722_v20 = vpop.f32.mrb[5].mxu0  ;;  %v155_v25 = vadd.f32 %v145_v17, %v3282_v24 }
  0xe3   :  { %v148_v21 = vpop.f32.mrb[6].mxu0 }
  0xe4   :  { %v156_v22 = vadd.f32 %v152_v19, %v3279_v18  ;;  %v2723_v23 = vpop.f32.mrb[7].mxu0  ;;  %v2559_v29 = vmul.f32 -1.442695, %v155_v25 }
  0xe6   :  { %2930 = vtanh.f32 %v156_v22  ;;  %v2560_v28 = vmul.f32 -1.442695, %v156_v22 }
  0xe7   :  { %2932 = vtanh.f32 %v155_v25 }
  0xe8   :  { %2934 = vpow2.f32 %v2560_v28 }
  0xe9   :  { %2936 = vpow2.f32 %v2559_v29 }
  0xf0   :  { %v2931_v26 = vpop.eup %2930 }
  0xf1   :  { %177 = vrot.lane.b32.xlu0 %v2931_v26, %s3195_s29  ;;  %v2933_v27 = vpop.eup %2932 }
  0xf2   :  { %v2935_v30 = vpop.eup %2934 }
  0xf3   :  { %v164_v31 = vadd.f32 1.0, %v2935_v30  ;;  %v2937_v32 = vpop.eup %2936 }
  0xf4   :  { %v163_v33 = vadd.f32 1.0, %v2937_v32 }
  0xf5   :  { %175 = vrot.lane.b32.xlu0 %v2933_v27, %s3195_s29  ;;  %2938 = vrcp.f32 %v164_v31 }
  0xf6   :  { %2940 = vrcp.f32 %v163_v33 }
  0xff   :  { %v2939_v34 = vpop.eup %2938 }
 0x100   :  { %v2941_v37 = vpop.eup %2940  ;;  %v172_v40 = vmul.f32 0.0, %v2939_v34 }
 0x101   :  { %v171_v43 = vmul.f32 0.0, %v2941_v37 }
 0x163   :  { %v178_v35 = vpop.permute.xlu0 %177 }
 0x164   :  { %v182_v36 = vmul.f32 %v2939_v34, %v178_v35 }
 0x166   :  { %187 = vrot.lane.b32.xlu1 %v182_v36, %s3196_s30 }
 0x167   :  { %v176_v38 = vpop.permute.xlu0 %175 }
 0x168   :  { %v181_v39 = vmul.f32 %v2941_v37, %v176_v38 }
 0x16a   :  { %185 = vrot.lane.b32.xlu1 %v181_v39, %s3196_s30 }
 0x1d8   :  { %v188_v41 = vpop.permute.xlu1 %187 }
 0x1d9   :  { %v3289_v42 = vadd.f32 %v188_v41, %v172_v40 }
 0x1db   :  { %2942 = vtanh.f32 %v3289_v42  ;;  %v283_v23 = vrot.slane %v3289_v42, 7 }
 0x1dc   :  { %v186_v44 = vpop.permute.xlu1 %185 }
 0x1dd   :  { %v3292_v45 = vadd.f32 %v186_v44, %v171_v43 }
 0x1df   :  { %2944 = vtanh.f32 %v3292_v45  ;;  %v282_v26 = vrot.slane %v3292_v45, 7 }
 0x1e5   :  { %v2943_v46 = vpop.eup %2942 }
 0x1e6   :  { %199 = vrot.lane.b32.xlu0 %v2943_v46, %s3195_s29 }
 0x1e9   :  { %v2945_v47 = vpop.eup %2944 }
 0x1ea   :  { %197 = vrot.lane.b32.xlu1 %v2945_v47, %s3195_s29 }
 0x258   :  { %v200_v48 = vpop.permute.xlu0 %199 }
 0x259   :  { %v3297_v49 = vmul.f32 %v2939_v34, %v200_v48 }
 0x25b   :  { %v206_v50 = vpack.c.bf16 %v3297_v49, %v3297_v49 }
 0x25c   :  { %v198_v51 = vpop.permute.xlu1 %197 }
 0x25d   :  { %v210_v52 = vunpack.c.l.b16 %v206_v50  ;;  %v3301_v53 = vmul.f32 %v2941_v37, %v198_v51 }
 0x25f   :  { %v205_v54 = vpack.c.bf16 %v3301_v53, %v3301_v53  ;;  %v211_v55 = vrot.slane %v210_v52, 7 }
 0x261   :  { %v209_v56 = vunpack.c.l.b16 %v205_v54 }
 0x263   :  { %v213_v57 = vsel %vm212_vm2, %v211_v55, %v209_v56 }
 0x264   :  { %v214_v58 = vpack.c.b16 %v213_v57, %v213_v57 }
 0x266   :  { %215 = vrot.lane.b32.xlu0 %v214_v58, %s3196_s30 }
 0x2d8   :  { %v216_v59 = vpop.permute.xlu0 %215 }
 0x2d9   :  { %2729 = vmatmul.mubr.msk.bf16.vlgmr.msra.gmra.mrb[8].mxu0 %vm107_vm3, %v216_v59 }
 0x2da   :  { %2741 = vmatpush3.bf16.msra.mxu0 %v3247_v5  ;;  %2744 = vmatprep.mubr.msk.bf16.mxu0 %vm3193_vm0, %v3192_v0 }
 0x2db   :  { %2742 = vmatprep.subr.bf16.mxu0 %v3192_v0 }
 0x2de   :  { %2743 = vmatpush3.bf16.msra.mxu0 %v3253_v6 }
 0x2df   :  { %2756 = vmatprep.subr.bf16.mxu0 %v3192_v0 }
 0x3ac   :  { %v254_v60 = vpop.f32.mrb[8].mxu0 }
 0x3ad   :  { %v261_v61 = vrot.slane %v254_v60, 7  ;;  %v265_v62 = vadd.f32 %v254_v60, %v3279_v18  ;;  %v2730_v63 = vpop.f32.mrb[9].mxu0 }
 0x3ae   :  { %v257_v1 = vpop.f32.mrb[10].mxu0 }
 0x3af   :  { %v264_v2 = vadd.f32 %v261_v61, %v3282_v24  ;;  %2946 = vtanh.f32 %v265_v62  ;;  %v2731_v3 = vpop.f32.mrb[11].mxu0  ;;  %v2563_v10 = vmul.f32 -1.442695, %v265_v62 }
 0x3b1   :  { %2948 = vtanh.f32 %v264_v2  ;;  %v2562_v11 = vmul.f32 -1.442695, %v264_v2 }
 0x3b2   :  { %2950 = vpow2.f32 %v2563_v10 }
 0x3b3   :  { %2952 = vpow2.f32 %v2562_v11 }
 0x3b9   :  { %v2947_v4 = vpop.eup %2946 }
 0x3ba   :  { %292 = vrot.lane.b32.xlu0 %v2947_v4, %s3195_s29 }
 0x3bb   :  { %v2949_v8 = vpop.eup %2948 }
 0x3bc   :  { %290 = vrot.lane.b32.xlu1 %v2949_v8, %s3195_s29  ;;  %v2951_v12 = vpop.eup %2950 }
 0x3bd   :  { %v2953_v13 = vpop.eup %2952  ;;  %v273_v14 = vadd.f32 1.0, %v2951_v12 }
 0x3be   :  { %v272_v15 = vadd.f32 1.0, %v2953_v13 }
 0x3bf   :  { %2954 = vrcp.f32 %v273_v14 }
 0x3c0   :  { %2956 = vrcp.f32 %v272_v15 }
 0x3c9   :  { %v2955_v16 = vpop.eup %2954 }
 0x3ca   :  { %v2957_v20 = vpop.eup %2956  ;;  %v287_v25 = vmul.f32 %v2955_v16, %v283_v23 }
 0x3cb   :  { %v286_v29 = vmul.f32 %v2957_v20, %v282_v26 }
 0x42c   :  { %v293_v17 = vpop.permute.xlu0 %292 }
 0x42d   :  { %v297_v19 = vmul.f32 %v2955_v16, %v293_v17 }
 0x42e   :  { %v291_v21 = vpop.permute.xlu1 %290 }
 0x42f   :  { %302 = vrot.lane.b32.xlu0 %v297_v19, %s3196_s30  ;;  %v296_v22 = vmul.f32 %v2957_v20, %v291_v21 }
 0x431   :  { %300 = vrot.lane.b32.xlu1 %v296_v22, %s3196_s30 }
 0x4a1   :  { %v303_v27 = vpop.permute.xlu0 %302 }
 0x4a2   :  { %v3322_v28 = vadd.f32 %v303_v27, %v287_v25 }
 0x4a3   :  { %v301_v30 = vpop.permute.xlu1 %300 }
 0x4a4   :  { %2958 = vtanh.f32 %v3322_v28  ;;  %v306_v31 = vadd.f32 %v301_v30, %v286_v29  ;;  %v398_v12 = vrot.slane %v3322_v28, 7 }
 0x4a6   :  { %2960 = vtanh.f32 %v306_v31  ;;  %v397_v11 = vrot.slane %v306_v31, 7 }
 0x4ae   :  { %v2959_v32 = vpop.eup %2958 }
 0x4af   :  { %314 = vrot.lane.b32.xlu0 %v2959_v32, %s3195_s29 }
 0x4b0   :  { %v2961_v33 = vpop.eup %2960 }
 0x4b1   :  { %312 = vrot.lane.b32.xlu1 %v2961_v33, %s3195_s29 }
 0x521   :  { %v315_v34 = vpop.permute.xlu0 %314 }
 0x522   :  { %v3327_v35 = vmul.f32 %v2955_v16, %v315_v34 }
 0x523   :  { %v313_v36 = vpop.permute.xlu1 %312 }
 0x524   :  { %v3329_v37 = vmul.f32 %v2957_v20, %v313_v36  ;;  %v321_v38 = vpack.c.bf16 %v3327_v35, %v3327_v35  ;;  %v1017_v28 = vsel %vm1015_vm4, %v3297_v49, %v3327_v35 }
 0x526   :  { %v320_v39 = vpack.c.bf16 %v3329_v37, %v3329_v37  ;;  %v325_v41 = vunpack.c.l.b16 %v321_v38  ;;  %v1016_v26 = vsel %vm1015_vm4, %v3301_v53, %v3329_v37  ;;  %vm2548_vm4 = vcmask 171008  }
 0x528   :  { %v324_v40 = vunpack.c.l.b16 %v320_v39 }
 0x52a   :  { %v326_v42 = vrot.slane %v324_v40, 1 }
 0x52c   :  { %v327_v43 = vsel %vm212_vm2, %v325_v41, %v326_v42 }
 0x52d   :  { %v328_v44 = vpack.c.b16 %v327_v43, %v327_v43 }
 0x52f   :  { %329 = vrot.lane.b32.xlu1 %v328_v44, %s3196_s30 }
 0x5a1   :  { %v330_v45 = vpop.permute.xlu1 %329 }
 0x5a2   :  { %2737 = vmatmul.mubr.msk.bf16.vlgmr.msra.gmra.mrb[0].mxu1 %vm107_vm3, %v330_v45 }
 0x5a3   :  { %2749 = vmatpush3.bf16.msra.mxu1 %v3247_v5  ;;  %2752 = vmatprep.mubr.msk.bf16.mxu1 %vm3193_vm0, %v3192_v0 }
 0x5a4   :  { %2750 = vmatprep.subr.bf16.mxu1 %v3192_v0 }
 0x5a7   :  { %2751 = vmatpush3.bf16.msra.mxu1 %v3253_v6 }
 0x5a8   :  { %2764 = vmatprep.subr.bf16.mxu1 %v3192_v0 }
 0x675   :  { %v368_v46 = vpop.f32.mrb[0].mxu1 }
 0x676   :  { %v375_v47 = vrot.slane %v368_v46, 6  ;;  %v376_v48 = vrot.slane %v368_v46, 7  ;;  %v2738_v50 = vpop.f32.mrb[1].mxu1 }
 0x677   :  { %v371_v51 = vpop.f32.mrb[2].mxu1 }
 0x678   :  { %v379_v52 = vadd.f32 %v375_v47, %v3282_v24  ;;  %v380_v54 = vadd.f32 %v376_v48, %v3279_v18  ;;  %v2739_v55 = vpop.f32.mrb[3].mxu1 }
 0x67a   :  { %2962 = vtanh.f32 %v379_v52  ;;  %v2565_v58 = vmul.f32 -1.442695, %v379_v52  ;;  %v2566_v59 = vmul.f32 -1.442695, %v380_v54 }
 0x67b   :  { %2964 = vtanh.f32 %v380_v54 }
 0x67c   :  { %2966 = vpow2.f32 %v2565_v58 }
 0x67d   :  { %2968 = vpow2.f32 %v2566_v59 }
 0x684   :  { %v2963_v56 = vpop.eup %2962 }
 0x685   :  { %v2965_v57 = vpop.eup %2964  ;;  %405 = vrot.lane.b32.xlu0 %v2963_v56, %s3195_s29 }
 0x686   :  { %407 = vrot.lane.b32.xlu1 %v2965_v57, %s3195_s29  ;;  %v2967_v60 = vpop.eup %2966 }
 0x687   :  { %v2969_v61 = vpop.eup %2968  ;;  %v387_v62 = vadd.f32 1.0, %v2967_v60 }
 0x688   :  { %v388_v63 = vadd.f32 1.0, %v2969_v61 }
 0x689   :  { %2970 = vrcp.f32 %v387_v62 }
 0x68a   :  { %2972 = vrcp.f32 %v388_v63 }
 0x693   :  { %v2971_v1 = vpop.eup %2970 }
 0x694   :  { %v2973_v3 = vpop.eup %2972  ;;  %v401_v13 = vmul.f32 %v2971_v1, %v397_v11 }
 0x695   :  { %v402_v14 = vmul.f32 %v2973_v3, %v398_v12 }
 0x6f7   :  { %v406_v2 = vpop.permute.xlu0 %405 }
 0x6f8   :  { %v408_v4 = vpop.permute.xlu1 %407  ;;  %v411_v8 = vmul.f32 %v2971_v1, %v406_v2 }
 0x6f9   :  { %v412_v10 = vmul.f32 %v2973_v3, %v408_v4 }
 0x6fa   :  { %415 = vrot.lane.b32.xlu0 %v411_v8, %s3196_s30 }
 0x6fb   :  { %417 = vrot.lane.b32.xlu1 %v412_v10, %s3196_s30 }
 0x76c   :  { %v416_v15 = vpop.permute.xlu0 %415 }
 0x76d   :  { %v418_v16 = vpop.permute.xlu1 %417  ;;  %v3351_v17 = vadd.f32 %v416_v15, %v401_v13 }
 0x76e   :  { %v3353_v19 = vadd.f32 %v418_v16, %v402_v14 }
 0x76f   :  { %2974 = vtanh.f32 %v3351_v17  ;;  %v513_v62 = vrot.slane %v3351_v17, 7 }
 0x770   :  { %2976 = vtanh.f32 %v3353_v19  ;;  %v514_v63 = vrot.slane %v3353_v19, 7 }
 0x779   :  { %v2975_v20 = vpop.eup %2974 }
 0x77a   :  { %v2977_v21 = vpop.eup %2976  ;;  %427 = vrot.lane.b32.xlu0 %v2975_v20, %s3195_s29 }
 0x77b   :  { %429 = vrot.lane.b32.xlu1 %v2977_v21, %s3195_s29 }
 0x7ec   :  { %v428_v22 = vpop.permute.xlu0 %427 }
 0x7ed   :  { %v430_v23 = vpop.permute.xlu1 %429  ;;  %v433_v25 = vmul.f32 %v2971_v1, %v428_v22 }
 0x7ee   :  { %v434_v27 = vmul.f32 %v2973_v3, %v430_v23 }
 0x7ef   :  { %v435_v29 = vpack.c.bf16 %v433_v25, %v433_v25  ;;  %v3364_v30 = vsel %vm1018_vm5, %v1016_v26, %v433_v25 }
 0x7f0   :  { %v436_v31 = vpack.c.bf16 %v434_v27, %v434_v27  ;;  %v3367_v32 = vsel %vm1018_vm5, %v1017_v28, %v434_v27 }
 0x7f1   :  { %v439_v33 = vunpack.c.l.b16 %v435_v29 }
 0x7f2   :  { %v440_v34 = vunpack.c.l.b16 %v436_v31 }
 0x7f3   :  { %v441_v36 = vrot.slane %v439_v33, 2 }
 0x7f4   :  { %v442_v38 = vrot.slane %v440_v34, 1 }
 0x7f6   :  { %v443_v39 = vsel %vm212_vm2, %v442_v38, %v441_v36 }
 0x7f7   :  { %v444_v40 = vpack.c.b16 %v443_v39, %v443_v39 }
 0x7f9   :  { %445 = vrot.lane.b32.xlu0 %v444_v40, %s3196_s30 }
 0x86b   :  { %v446_v53 = vpop.permute.xlu0 %445 }
 0x86c   :  { %2745 = vmatmul.mubr.msk.bf16.vlgmr.msra.gmra.mrb[12].mxu0 %vm107_vm3, %v446_v53 }
 0x86d   :  { %2757 = vmatpush3.bf16.msra.mxu0 %v3247_v5  ;;  %2760 = vmatprep.mubr.msk.bf16.mxu0 %vm3193_vm0, %v3192_v0 }
 0x86e   :  { %2758 = vmatprep.subr.bf16.mxu0 %v3192_v0 }
 0x871   :  { %2759 = vmatpush3.bf16.msra.mxu0 %v3253_v6 }
 0x872   :  { %2772 = vmatprep.subr.bf16.mxu0 %v3192_v0 }
 0x93f   :  { %v484_v49 = vpop.f32.mrb[12].mxu0 }
 0x940   :  { %v491_v35 = vrot.slane %v484_v49, 5  ;;  %v492_v37 = vrot.slane %v484_v49, 6  ;;  %v2746_v41 = vpop.f32.mrb[13].mxu0 }
 0x941   :  { %v487_v42 = vpop.f32.mrb[14].mxu0 }
 0x942   :  { %v495_v43 = vadd.f32 %v491_v35, %v3282_v24  ;;  %v496_v44 = vadd.f32 %v492_v37, %v3279_v18  ;;  %v2747_v45 = vpop.f32.mrb[15].mxu0 }
 0x944   :  { %2978 = vtanh.f32 %v495_v43  ;;  %v2568_v48 = vmul.f32 -1.442695, %v495_v43  ;;  %v2569_v50 = vmul.f32 -1.442695, %v496_v44 }
 0x945   :  { %2980 = vtanh.f32 %v496_v44 }
 0x946   :  { %2982 = vpow2.f32 %v2568_v48 }
 0x947   :  { %2984 = vpow2.f32 %v2569_v50 }
 0x94e   :  { %v2979_v46 = vpop.eup %2978 }
 0x94f   :  { %v2981_v47 = vpop.eup %2980  ;;  %521 = vrot.lane.b32.xlu1 %v2979_v46, %s3195_s29 }
 0x950   :  { %523 = vrot.lane.b32.xlu0 %v2981_v47, %s3195_s29  ;;  %v2983_v51 = vpop.eup %2982 }
 0x951   :  { %v2985_v52 = vpop.eup %2984  ;;  %v503_v54 = vadd.f32 1.0, %v2983_v51 }
 0x952   :  { %v504_v55 = vadd.f32 1.0, %v2985_v52 }
 0x953   :  { %2986 = vrcp.f32 %v503_v54 }
 0x954   :  { %2988 = vrcp.f32 %v504_v55 }
 0x95d   :  { %v2987_v56 = vpop.eup %2986 }
 0x95e   :  { %v2989_v58 = vpop.eup %2988  ;;  %v517_v1 = vmul.f32 %v2987_v56, %v513_v62 }
 0x95f   :  { %v518_v2 = vmul.f32 %v2989_v58, %v514_v63 }
 0x9c1   :  { %v522_v57 = vpop.permute.xlu1 %521 }
 0x9c2   :  { %v524_v59 = vpop.permute.xlu0 %523  ;;  %v527_v60 = vmul.f32 %v2987_v56, %v522_v57 }
 0x9c3   :  { %v528_v61 = vmul.f32 %v2989_v58, %v524_v59 }
 0x9c4   :  { %531 = vrot.lane.b32.xlu1 %v527_v60, %s3196_s30 }
 0x9c5   :  { %533 = vrot.lane.b32.xlu0 %v528_v61, %s3196_s30 }
 0xa36   :  { %v532_v3 = vpop.permute.xlu1 %531 }
 0xa37   :  { %v534_v4 = vpop.permute.xlu0 %533  ;;  %v3386_v8 = vadd.f32 %v532_v3, %v517_v1 }
 0xa38   :  { %v3388_v10 = vadd.f32 %v534_v4, %v518_v2 }
 0xa39   :  { %2990 = vtanh.f32 %v3386_v8  ;;  %v629_v51 = vrot.slane %v3386_v8, 7 }
 0xa3a   :  { %2992 = vtanh.f32 %v3388_v10  ;;  %v630_v52 = vrot.slane %v3388_v10, 7 }
 0xa43   :  { %v2991_v11 = vpop.eup %2990 }
 0xa44   :  { %v2993_v12 = vpop.eup %2992  ;;  %543 = vrot.lane.b32.xlu1 %v2991_v11, %s3195_s29 }
 0xa45   :  { %545 = vrot.lane.b32.xlu0 %v2993_v12, %s3195_s29 }
 0xab6   :  { %v544_v13 = vpop.permute.xlu1 %543 }
 0xab7   :  { %v546_v14 = vpop.permute.xlu0 %545  ;;  %v549_v15 = vmul.f32 %v2987_v56, %v544_v13 }
 0xab8   :  { %v550_v16 = vmul.f32 %v2989_v58, %v546_v14 }
 0xab9   :  { %v551_v17 = vpack.c.bf16 %v549_v15, %v549_v15  ;;  %v3395_v19 = vsel %vm1021_vm6, %v3364_v30, %v549_v15 }
 0xaba   :  { %v552_v20 = vpack.c.bf16 %v550_v16, %v550_v16  ;;  %v3398_v21 = vsel %vm1021_vm6, %v3367_v32, %v550_v16 }
 0xabb   :  { %v555_v22 = vunpack.c.l.b16 %v551_v17 }
 0xabc   :  { %v556_v23 = vunpack.c.l.b16 %v552_v20 }
 0xabd   :  { %v557_v25 = vrot.slane %v555_v22, 3 }
 0xabe   :  { %v558_v26 = vrot.slane %v556_v23, 2 }
 0xac0   :  { %v559_v27 = vsel %vm212_vm2, %v558_v26, %v557_v25 }
 0xac1   :  { %v560_v28 = vpack.c.b16 %v559_v27, %v559_v27 }
 0xac3   :  { %561 = vrot.lane.b32.xlu1 %v560_v28, %s3196_s30 }
 0xb35   :  { %v562_v29 = vpop.permute.xlu1 %561 }
 0xb36   :  { %2753 = vmatmul.mubr.msk.bf16.vlgmr.msra.gmra.mrb[4].mxu1 %vm107_vm3, %v562_v29 }
 0xb37   :  { %2765 = vmatpush3.bf16.msra.mxu1 %v3247_v5  ;;  %2768 = vmatprep.mubr.msk.bf16.mxu1 %vm3193_vm0, %v3192_v0 }
 0xb38   :  { %2766 = vmatprep.subr.bf16.mxu1 %v3192_v0 }
 0xb3b   :  { %2767 = vmatpush3.bf16.msra.mxu1 %v3253_v6 }
 0xb3c   :  { %2780 = vmatprep.subr.bf16.mxu1 %v3192_v0 }
 0xc09   :  { %v600_v30 = vpop.f32.mrb[4].mxu1 }
 0xc0a   :  { %v607_v31 = vrot.slane %v600_v30, 4  ;;  %v608_v32 = vrot.slane %v600_v30, 5  ;;  %v2754_v33 = vpop.f32.mrb[5].mxu1 }
 0xc0b   :  { %v603_v34 = vpop.f32.mrb[6].mxu1 }
 0xc0c   :  { %v611_v36 = vadd.f32 %v607_v31, %v3282_v24  ;;  %v612_v38 = vadd.f32 %v608_v32, %v3279_v18  ;;  %v2755_v39 = vpop.f32.mrb[7].mxu1 }
 0xc0e   :  { %2994 = vtanh.f32 %v611_v36  ;;  %v2571_v49 = vmul.f32 -1.442695, %v611_v36  ;;  %v2572_v35 = vmul.f32 -1.442695, %v612_v38 }
 0xc0f   :  { %2996 = vtanh.f32 %v612_v38 }
 0xc10   :  { %2998 = vpow2.f32 %v2571_v49 }
 0xc11   :  { %3000 = vpow2.f32 %v2572_v35 }
 0xc18   :  { %v2995_v40 = vpop.eup %2994 }
 0xc19   :  { %v2997_v53 = vpop.eup %2996  ;;  %637 = vrot.lane.b32.xlu0 %v2995_v40, %s3195_s29 }
 0xc1a   :  { %639 = vrot.lane.b32.xlu1 %v2997_v53, %s3195_s29  ;;  %v2999_v37 = vpop.eup %2998 }
 0xc1b   :  { %v3001_v41 = vpop.eup %3000  ;;  %v619_v42 = vadd.f32 1.0, %v2999_v37 }
 0xc1c   :  { %v620_v43 = vadd.f32 1.0, %v3001_v41 }
 0xc1d   :  { %3002 = vrcp.f32 %v619_v42 }
 0xc1e   :  { %3004 = vrcp.f32 %v620_v43 }
 0xc27   :  { %v3003_v44 = vpop.eup %3002 }
 0xc28   :  { %v3005_v46 = vpop.eup %3004  ;;  %v633_v54 = vmul.f32 %v3003_v44, %v629_v51 }
 0xc29   :  { %v634_v55 = vmul.f32 %v3005_v46, %v630_v52 }
 0xc8b   :  { %v638_v45 = vpop.permute.xlu0 %637 }
 0xc8c   :  { %v640_v47 = vpop.permute.xlu1 %639  ;;  %v643_v48 = vmul.f32 %v3003_v44, %v638_v45 }
 0xc8d   :  { %v644_v50 = vmul.f32 %v3005_v46, %v640_v47 }
 0xc8e   :  { %647 = vrot.lane.b32.xlu0 %v643_v48, %s3196_s30 }
 0xc8f   :  { %649 = vrot.lane.b32.xlu1 %v644_v50, %s3196_s30 }
 0xd00   :  { %v648_v56 = vpop.permute.xlu0 %647 }
 0xd01   :  { %v650_v57 = vpop.permute.xlu1 %649  ;;  %v3417_v58 = vadd.f32 %v648_v56, %v633_v54 }
 0xd02   :  { %v3419_v59 = vadd.f32 %v650_v57, %v634_v55 }
 0xd03   :  { %3006 = vtanh.f32 %v3417_v58  ;;  %v745_v49 = vrot.slane %v3417_v58, 7 }
 0xd04   :  { %3008 = vtanh.f32 %v3419_v59  ;;  %v746_v35 = vrot.slane %v3419_v59, 7 }
 0xd0d   :  { %v3007_v60 = vpop.eup %3006 }
 0xd0e   :  { %v3009_v61 = vpop.eup %3008  ;;  %659 = vrot.lane.b32.xlu0 %v3007_v60, %s3195_s29 }
 0xd0f   :  { %661 = vrot.lane.b32.xlu1 %v3009_v61, %s3195_s29 }
 0xd80   :  { %v660_v62 = vpop.permute.xlu0 %659 }
 0xd81   :  { %v662_v63 = vpop.permute.xlu1 %661  ;;  %v665_v1 = vmul.f32 %v3003_v44, %v660_v62 }
 0xd82   :  { %v666_v2 = vmul.f32 %v3005_v46, %v662_v63 }
 0xd83   :  { %v667_v3 = vpack.c.bf16 %v665_v1, %v665_v1  ;;  %v3427_v4 = vsel %vm1024_vm7, %v3395_v19, %v665_v1 }
 0xd84   :  { %v668_v8 = vpack.c.bf16 %v666_v2, %v666_v2  ;;  %v3431_v10 = vsel %vm1024_vm7, %v3398_v21, %v666_v2 }
 0xd85   :  { %v671_v11 = vunpack.c.l.b16 %v667_v3 }
 0xd86   :  { %v672_v12 = vunpack.c.l.b16 %v668_v8 }
 0xd87   :  { %v673_v13 = vrot.slane %v671_v11, 4 }
 0xd88   :  { %v674_v14 = vrot.slane %v672_v12, 3 }
 0xd8a   :  { %v675_v15 = vsel %vm212_vm2, %v674_v14, %v673_v13 }
 0xd8b   :  { %v676_v16 = vpack.c.b16 %v675_v15, %v675_v15 }
 0xd8d   :  { %677 = vrot.lane.b32.xlu0 %v676_v16, %s3196_s30 }
 0xdff   :  { %v678_v17 = vpop.permute.xlu0 %677 }
 0xe00   :  { %2761 = vmatmul.mubr.msk.bf16.vlgmr.msra.gmra.mrb[16].mxu0 %vm107_vm3, %v678_v17 }
 0xe01   :  { %2773 = vmatpush3.bf16.msra.mxu0 %v3247_v5  ;;  %2776 = vmatprep.mubr.msk.bf16.mxu0 %vm3193_vm0, %v3192_v0 }
 0xe02   :  { %2774 = vmatprep.subr.bf16.mxu0 %v3192_v0 }
 0xe05   :  { %2775 = vmatpush3.bf16.msra.mxu0 %v3253_v6 }
 0xe06   :  { %2788 = vmatprep.subr.bf16.mxu0 %v3192_v0 }
 0xed3   :  { %v716_v19 = vpop.f32.mrb[16].mxu0 }
 0xed4   :  { %v723_v20 = vrot.slane %v716_v19, 3  ;;  %v724_v21 = vrot.slane %v716_v19, 4  ;;  %v2762_v22 = vpop.f32.mrb[17].mxu0 }
 0xed5   :  { %v719_v23 = vpop.f32.mrb[18].mxu0 }
 0xed6   :  { %v727_v25 = vadd.f32 %v723_v20, %v3282_v24  ;;  %v728_v26 = vadd.f32 %v724_v21, %v3279_v18  ;;  %v2763_v27 = vpop.f32.mrb[19].mxu0 }
 0xed8   :  { %3010 = vtanh.f32 %v727_v25  ;;  %v2574_v6 = vmul.f32 -1.442695, %v727_v25  ;;  %v2575_v29 = vmul.f32 -1.442695, %v728_v26 }
 0xed9   :  { %3012 = vtanh.f32 %v728_v26 }
 0xeda   :  { %3014 = vpow2.f32 %v2574_v6 }
 0xedb   :  { %3016 = vpow2.f32 %v2575_v29 }
 0xee2   :  { %v3011_v5 = vpop.eup %3010 }
 0xee3   :  { %v3013_v28 = vpop.eup %3012  ;;  %753 = vrot.lane.b32.xlu1 %v3011_v5, %s3195_s29 }
 0xee4   :  { %755 = vrot.lane.b32.xlu0 %v3013_v28, %s3195_s29  ;;  %v3015_v30 = vpop.eup %3014 }
 0xee5   :  { %v3017_v31 = vpop.eup %3016  ;;  %v735_v32 = vadd.f32 1.0, %v3015_v30 }
 0xee6   :  { %v736_v33 = vadd.f32 1.0, %v3017_v31 }
 0xee7   :  { %3018 = vrcp.f32 %v735_v32 }
 0xee8   :  { %3020 = vrcp.f32 %v736_v33 }
 0xef1   :  { %v3019_v34 = vpop.eup %3018 }
 0xef2   :  { %v3021_v38 = vpop.eup %3020  ;;  %v749_v37 = vmul.f32 %v3019_v34, %v745_v49 }
 0xef3   :  { %v750_v41 = vmul.f32 %v3021_v38, %v746_v35 }
 0xf55   :  { %v754_v36 = vpop.permute.xlu1 %753 }
 0xf56   :  { %v756_v39 = vpop.permute.xlu0 %755  ;;  %v759_v40 = vmul.f32 %v3019_v34, %v754_v36 }
 0xf57   :  { %v760_v53 = vmul.f32 %v3021_v38, %v756_v39 }
 0xf58   :  { %763 = vrot.lane.b32.xlu1 %v759_v40, %s3196_s30 }
 0xf59   :  { %765 = vrot.lane.b32.xlu0 %v760_v53, %s3196_s30 }
 0xfca   :  { %v764_v42 = vpop.permute.xlu1 %763 }
 0xfcb   :  { %v766_v43 = vpop.permute.xlu0 %765  ;;  %v769_v44 = vadd.f32 %v764_v42, %v749_v37 }
 0xfcc   :  { %v770_v45 = vadd.f32 %v766_v43, %v750_v41 }
 0xfcd   :  { %3022 = vtanh.f32 %v769_v44  ;;  %v861_v6 = vrot.slane %v769_v44, 7 }
 0xfce   :  { %3024 = vtanh.f32 %v770_v45  ;;  %v862_v29 = vrot.slane %v770_v45, 7 }
 0xfd7   :  { %v3023_v46 = vpop.eup %3022 }
 0xfd8   :  { %v3025_v47 = vpop.eup %3024  ;;  %775 = vrot.lane.b32.xlu1 %v3023_v46, %s3195_s29 }
 0xfd9   :  { %777 = vrot.lane.b32.xlu0 %v3025_v47, %s3195_s29 }
0x104a   :  { %v776_v48 = vpop.permute.xlu1 %775 }
0x104b   :  { %v778_v50 = vpop.permute.xlu0 %777  ;;  %v781_v51 = vmul.f32 %v3019_v34, %v776_v48 }
0x104c   :  { %v782_v52 = vmul.f32 %v3021_v38, %v778_v50 }
0x104d   :  { %v783_v54 = vpack.c.bf16 %v781_v51, %v781_v51  ;;  %v3453_v55 = vsel %vm1027_vm8, %v3427_v4, %v781_v51 }
0x104e   :  { %v784_v56 = vpack.c.bf16 %v782_v52, %v782_v52  ;;  %v3456_v57 = vsel %vm1027_vm8, %v3431_v10, %v782_v52 }
0x104f   :  { %v787_v58 = vunpack.c.l.b16 %v783_v54 }
0x1050   :  { %v788_v59 = vunpack.c.l.b16 %v784_v56 }
0x1051   :  { %v789_v60 = vrot.slane %v787_v58, 5 }
0x1052   :  { %v790_v61 = vrot.slane %v788_v59, 4 }
0x1054   :  { %v791_v62 = vsel %vm212_vm2, %v790_v61, %v789_v60 }
0x1055   :  { %v792_v63 = vpack.c.b16 %v791_v62, %v791_v62 }
0x1057   :  { %793 = vrot.lane.b32.xlu1 %v792_v63, %s3196_s30 }
0x10c9   :  { %v794_v1 = vpop.permute.xlu1 %793 }
0x10ca   :  { %2769 = vmatmul.mubr.msk.bf16.vlgmr.msra.gmra.mrb[8].mxu1 %vm107_vm3, %v794_v1 }
0x10cb   :  { %2784 = vmatprep.mubr.msk.bf16.mxu1 %vm3193_vm0, %v3192_v0 }
0x119d   :  { %v832_v2 = vpop.f32.mrb[8].mxu1 }
0x119e   :  { %v839_v3 = vrot.slane %v832_v2, 2  ;;  %v840_v4 = vrot.slane %v832_v2, 3  ;;  %v2770_v8 = vpop.f32.mrb[9].mxu1 }
0x119f   :  { %v835_v10 = vpop.f32.mrb[10].mxu1 }
0x11a0   :  { %v843_v11 = vadd.f32 %v839_v3, %v3282_v24  ;;  %v844_v12 = vadd.f32 %v840_v4, %v3279_v18  ;;  %v2771_v13 = vpop.f32.mrb[11].mxu1 }
0x11a2   :  { %3026 = vtanh.f32 %v843_v11  ;;  %v2577_v16 = vmul.f32 -1.442695, %v843_v11  ;;  %v2578_v17 = vmul.f32 -1.442695, %v844_v12 }
0x11a3   :  { %3028 = vtanh.f32 %v844_v12 }
0x11a4   :  { %3030 = vpow2.f32 %v2577_v16 }
0x11a5   :  { %3032 = vpow2.f32 %v2578_v17 }
0x11ac   :  { %v3027_v14 = vpop.eup %3026 }
0x11ad   :  { %v3029_v15 = vpop.eup %3028  ;;  %869 = vrot.lane.b32.xlu0 %v3027_v14, %s3195_s29 }
0x11ae   :  { %871 = vrot.lane.b32.xlu1 %v3029_v15, %s3195_s29  ;;  %v3031_v19 = vpop.eup %3030 }
0x11af   :  { %v3033_v20 = vpop.eup %3032  ;;  %v851_v21 = vadd.f32 1.0, %v3031_v19 }
0x11b0   :  { %v852_v22 = vadd.f32 1.0, %v3033_v20 }
0x11b1   :  { %3034 = vrcp.f32 %v851_v21 }
0x11b2   :  { %3036 = vrcp.f32 %v852_v22 }
0x11bb   :  { %v3035_v23 = vpop.eup %3034 }
0x11bc   :  { %v3037_v26 = vpop.eup %3036  ;;  %v865_v30 = vmul.f32 %v3035_v23, %v861_v6 }
0x11bd   :  { %v866_v31 = vmul.f32 %v3037_v26, %v862_v29 }
0x121f   :  { %v870_v25 = vpop.permute.xlu0 %869 }
0x1220   :  { %v872_v27 = vpop.permute.xlu1 %871  ;;  %v875_v5 = vmul.f32 %v3035_v23, %v870_v25  ;;  %v3494_v25 = vld [vmem:[%s3810_s2 + $0x28] sm:$0xff]  }
0x1221   :  { %v876_v28 = vmul.f32 %v3037_v26, %v872_v27  ;;  %v3503_v27 = vld [vmem:[%s3810_s2 + $0x30] sm:$0xff]  }
0x1222   :  { %879 = vrot.lane.b32.xlu0 %v875_v5, %s3196_s30 }
0x1223   :  { %881 = vrot.lane.b32.xlu1 %v876_v28, %s3196_s30 }
0x1294   :  { %v880_v32 = vpop.permute.xlu0 %879 }
0x1295   :  { %v882_v33 = vpop.permute.xlu1 %881  ;;  %v885_v34 = vadd.f32 %v880_v32, %v865_v30 }
0x1296   :  { %v886_v36 = vadd.f32 %v882_v33, %v866_v31 }
0x1297   :  { %3038 = vtanh.f32 %v885_v34  ;;  %v977_v14 = vrot.slane %v885_v34, 7 }
0x1298   :  { %3040 = vtanh.f32 %v886_v36  ;;  %v978_v15 = vrot.slane %v886_v36, 7 }
0x12a1   :  { %v3039_v38 = vpop.eup %3038 }
0x12a2   :  { %v3041_v39 = vpop.eup %3040  ;;  %891 = vrot.lane.b32.xlu0 %v3039_v38, %s3195_s29 }
0x12a3   :  { %893 = vrot.lane.b32.xlu1 %v3041_v39, %s3195_s29 }
0x1314   :  { %v892_v40 = vpop.permute.xlu0 %891 }
0x1315   :  { %v894_v53 = vpop.permute.xlu1 %893  ;;  %v897_v49 = vmul.f32 %v3035_v23, %v892_v40  ;;  %v2868_v23 = vld [vmem:[%s3810_s2 + $0x18] sm:$0xff]  }
0x1316   :  { %v898_v35 = vmul.f32 %v3037_v26, %v894_v53  ;;  %2781 = vmatpush3.bf16.msra.mxu1 %v2868_v23  ;;  %v2870_v26 = vld [vmem:[%s3810_s2 + $0x20] sm:$0xff]   ;;  %s3198_s2 = smov 4  }
0x1317   :  { %v899_v37 = vpack.c.bf16 %v897_v49, %v897_v49  ;;  %v3472_v41 = vsel %vm1030_vm9, %v3453_v55, %v897_v49  ;;  %2782 = vmatprep.subr.bf16.mxu1 %v3192_v0  ;;  %v1039_v49 = vsub.s32 1, %v3273_v9 }
0x1318   :  { %v900_v42 = vpack.c.bf16 %v898_v35, %v898_v35  ;;  %v3475_v43 = vsel %vm1030_vm9, %v3456_v57, %v898_v35  ;;  %v3190_v35 = vld [vmem:[%s3812_s4] sm:$0xff] }
0x1319   :  { %v903_v44 = vunpack.c.l.b16 %v899_v37  ;;  %v1040_v37 = vrot.slane %v3190_v35, %v1039_v49 }
0x131a   :  { %v904_v45 = vunpack.c.l.b16 %v900_v42  ;;  %2783 = vmatpush3.bf16.msra.mxu1 %v2870_v26 }
0x131b   :  { %v905_v46 = vrot.slane %v903_v44, 6  ;;  %2796 = vmatprep.subr.bf16.mxu1 %v3192_v0 }
0x131c   :  { %v906_v47 = vrot.slane %v904_v45, 5 }
0x131e   :  { %v907_v48 = vsel %vm212_vm2, %v906_v47, %v905_v46 }
0x131f   :  { %v908_v50 = vpack.c.b16 %v907_v48, %v907_v48 }
0x1321   :  { %909 = vrot.lane.b32.xlu0 %v908_v50, %s3196_s30 }
0x1393   :  { %v910_v51 = vpop.permute.xlu0 %909 }
0x1394   :  { %2777 = vmatmul.mubr.msk.bf16.vlgmr.msra.gmra.mrb[20].mxu0 %vm107_vm3, %v910_v51 }
0x1395   :  { %2792 = vmatprep.mubr.msk.bf16.mxu0 %vm3193_vm0, %v3192_v0  ;;  %2789 = vmatpush3.bf16.msra.mxu0 %v3494_v25 }
0x1396   :  { %2790 = vmatprep.subr.bf16.mxu0 %v3192_v0 }
0x1399   :  { %2791 = vmatpush3.bf16.msra.mxu0 %v3503_v27 }
0x139a   :  { %2804 = vmatprep.subr.bf16.mxu0 %v3192_v0 }
0x139c   :  { %2793 = vmatmul.mubr.bf16.vlgmr.msra.gmra.mrb[24].mxu0 %v3194_v7 }
0x139d   :  { %2805 = vmatpush3.bf16.msra.mxu0 %v3494_v25  ;;  %2808 = vmatprep.mubr.msk.bf16.mxu0 %vm3193_vm0, %v3192_v0 }
0x139e   :  { %2806 = vmatprep.subr.bf16.mxu0 %v3192_v0 }
0x13a1   :  { %2807 = vmatpush3.bf16.msra.mxu0 %v3503_v27 }
0x13a2   :  { %2820 = vmatprep.subr.bf16.mxu0 %v3192_v0 }
0x1467   :  { %v948_v52 = vpop.f32.mrb[20].mxu0 }
0x1468   :  { %v955_v54 = vrot.slane %v948_v52, 1  ;;  %v956_v55 = vrot.slane %v948_v52, 2  ;;  %v2778_v56 = vpop.f32.mrb[21].mxu0 }
0x1469   :  { %v951_v57 = vpop.f32.mrb[22].mxu0 }
0x146a   :  { %v959_v58 = vadd.f32 %v955_v54, %v3282_v24  ;;  %v960_v59 = vadd.f32 %v956_v55, %v3279_v18  ;;  %v2779_v60 = vpop.f32.mrb[23].mxu0 }
0x146c   :  { %3042 = vtanh.f32 %v959_v58  ;;  %v2580_v63 = vmul.f32 -1.442695, %v959_v58  ;;  %v2581_v1 = vmul.f32 -1.442695, %v960_v59 }
0x146d   :  { %3044 = vtanh.f32 %v960_v59 }
0x146e   :  { %3046 = vpow2.f32 %v2580_v63 }
0x146f   :  { %3048 = vpow2.f32 %v2581_v1  ;;  %v1146_v38 = vpop.f32.mrb[24].mxu0 }
0x1470   :  { %v2794_v39 = vpop.f32.mrb[25].mxu0 }
0x1471   :  { %v1149_v40 = vpop.f32.mrb[26].mxu0 }
0x1472   :  { %v2795_v53 = vpop.f32.mrb[27].mxu0 }
0x1476   :  { %v3043_v61 = vpop.eup %3042 }
0x1477   :  { %v3045_v62 = vpop.eup %3044  ;;  %985 = vrot.lane.b32.xlu1 %v3043_v61, %s3195_s29 }
0x1478   :  { %987 = vrot.lane.b32.xlu0 %v3045_v62, %s3195_s29  ;;  %v3047_v2 = vpop.eup %3046 }
0x1479   :  { %v3049_v3 = vpop.eup %3048  ;;  %v967_v4 = vadd.f32 1.0, %v3047_v2 }
0x147a   :  { %v968_v8 = vadd.f32 1.0, %v3049_v3 }
0x147b   :  { %3050 = vrcp.f32 %v967_v4 }
0x147c   :  { %3052 = vrcp.f32 %v968_v8 }
0x1485   :  { %v3051_v18 = vpop.eup %3050 }
0x1486   :  { %v3053_v10 = vpop.eup %3052  ;;  %v981_v16 = vmul.f32 %v3051_v18, %v977_v14 }
0x1487   :  { %v982_v17 = vmul.f32 %v3053_v10, %v978_v15 }
0x14e9   :  { %v986_v24 = vpop.permute.xlu1 %985 }
0x14ea   :  { %v988_v11 = vpop.permute.xlu0 %987  ;;  %v991_v12 = vmul.f32 %v3051_v18, %v986_v24 }
0x14eb   :  { %v992_v13 = vmul.f32 %v3053_v10, %v988_v11 }
0x14ec   :  { %995 = vrot.lane.b32.xlu1 %v991_v12, %s3196_s30 }
0x14ed   :  { %997 = vrot.lane.b32.xlu0 %v992_v13, %s3196_s30 }
0x155e   :  { %v996_v19 = vpop.permute.xlu1 %995 }
0x155f   :  { %v998_v20 = vpop.permute.xlu0 %997  ;;  %v1001_v21 = vadd.f32 %v996_v19, %v981_v16 }
0x1560   :  { %v1002_v22 = vadd.f32 %v998_v20, %v982_v17 }
0x1561   :  { %3054 = vtanh.f32 %v1001_v21 }
0x1562   :  { %3056 = vtanh.f32 %v1002_v22 }
0x156b   :  { %v3055_v5 = vpop.eup %3054 }
0x156c   :  { %v3057_v28 = vpop.eup %3056  ;;  %1007 = vrot.lane.b32.xlu1 %v3055_v5, %s3195_s29 }
0x156d   :  { %1009 = vrot.lane.b32.xlu0 %v3057_v28, %s3195_s29 }
0x15de   :  { %v1008_v6 = vpop.permute.xlu1 %1007 }
0x15df   :  { %v1010_v29 = vpop.permute.xlu0 %1009  ;;  %v1013_v30 = vmul.f32 %v3051_v18, %v1008_v6 }
0x15e0   :  { %v1014_v31 = vmul.f32 %v3053_v10, %v1010_v29 }
0x15e1   :  { %v1034_v32 = vsel %vm1033_vm10, %v3472_v41, %v1013_v30 }
0x15e2   :  { %v1035_v33 = vsel %vm1033_vm10, %v3475_v43, %v1014_v31  ;;  %v1153_v43 = vrot.slane %v1146_v38, 1 }
0x15e3   :  { %v1036_v34 = vpack.c.bf16 %v1035_v33, %v1034_v32 }
0x15e5   :  { %1042 = vrot.lane.b32.xlu1 %v1036_v34, %s3196_s30 }
0x1657   :  { %v1043_v36 = vpop.permute.xlu1 %1042 }
0x1658   :  { %2785 = vmatmul.mubr.msk.bf16.vlgmr.msra.gmra.mrb[12].mxu1 %vm107_vm3, %v1043_v36 }
0x1659   :  { %2797 = vmatpush3.bf16.msra.mxu1 %v3494_v25  ;;  %2800 = vmatprep.mubr.msk.bf16.mxu1 %vm3193_vm0, %v3192_v0 }
0x165a   :  { %2798 = vmatprep.subr.bf16.mxu1 %v3192_v0 }
0x165d   :  { %2799 = vmatpush3.bf16.msra.mxu1 %v3503_v27 }
0x165e   :  { %2812 = vmatprep.subr.bf16.mxu1 %v3192_v0 }
0x172b   :  { %v1093_v41 = vpop.f32.mrb[12].mxu1 }
0x172c   :  { %v3533_v42 = vadd.f32 %v1093_v41, %v1040_v37  ;;  %v2786_v44 = vpop.f32.mrb[13].mxu1 }
0x172d   :  { %v1096_v45 = vpop.f32.mrb[14].mxu1 }
0x172e   :  { %v1156_v46 = vadd.f32 %v1146_v38, %v3533_v42  ;;  %v3536_v47 = vadd.f32 %v1096_v45, %v1040_v37  ;;  %v2787_v48 = vpop.f32.mrb[15].mxu1 }
0x1730   :  { %3058 = vtanh.f32 %v1156_v46  ;;  %v1157_v50 = vadd.f32 %v1153_v43, %v3536_v47  ;;  %v2587_v54 = vmul.f32 -1.442695, %v1156_v46 }
0x1732   :  { %3060 = vtanh.f32 %v1157_v50  ;;  %v2588_v55 = vmul.f32 -1.442695, %v1157_v50 }
0x1733   :  { %3062 = vpow2.f32 %v2587_v54 }
0x1734   :  { %3064 = vpow2.f32 %v2588_v55 }
0x173a   :  { %v3059_v51 = vpop.eup %3058 }
0x173b   :  { %1176 = vrot.lane.b32.xlu1 %v3059_v51, %s3195_s29 }
0x173c   :  { %v3061_v52 = vpop.eup %3060 }
0x173d   :  { %1178 = vrot.lane.b32.xlu0 %v3061_v52, %s3195_s29  ;;  %v3063_v56 = vpop.eup %3062 }
0x173e   :  { %v3065_v57 = vpop.eup %3064  ;;  %v1164_v58 = vadd.f32 1.0, %v3063_v56 }
0x173f   :  { %v1165_v59 = vadd.f32 1.0, %v3065_v57 }
0x1740   :  { %3066 = vrcp.f32 %v1164_v58 }
0x1741   :  { %3068 = vrcp.f32 %v1165_v59 }
0x174a   :  { %v3067_v60 = vpop.eup %3066 }
0x174b   :  { %v3069_v63 = vpop.eup %3068  ;;  %v1172_v3 = vmul.f32 0.0, %v3067_v60 }
0x174c   :  { %v1173_v18 = vmul.f32 0.0, %v3069_v63 }
0x17ad   :  { %v1177_v61 = vpop.permute.xlu1 %1176 }
0x17ae   :  { %v1182_v62 = vmul.f32 %v3067_v60, %v1177_v61 }
0x17af   :  { %v1179_v1 = vpop.permute.xlu0 %1178 }
0x17b0   :  { %1186 = vrot.lane.b32.xlu1 %v1182_v62, %s3196_s30  ;;  %v1183_v2 = vmul.f32 %v3069_v63, %v1179_v1 }
0x17b2   :  { %1188 = vrot.lane.b32.xlu0 %v1183_v2, %s3196_s30 }
0x1822   :  { %v1187_v4 = vpop.permute.xlu1 %1186 }
0x1823   :  { %v3543_v8 = vadd.f32 %v1187_v4, %v1172_v3 }
0x1824   :  { %v1189_v24 = vpop.permute.xlu0 %1188 }
0x1825   :  { %3070 = vtanh.f32 %v3543_v8  ;;  %v1193_v10 = vadd.f32 %v1189_v24, %v1173_v18  ;;  %v1282_v51 = vrot.slane %v3543_v8, 7 }
0x1827   :  { %3072 = vtanh.f32 %v1193_v10  ;;  %v1283_v48 = vrot.slane %v1193_v10, 7 }
0x182f   :  { %v3071_v11 = vpop.eup %3070 }
0x1830   :  { %1198 = vrot.lane.b32.xlu1 %v3071_v11, %s3195_s29 }
0x1831   :  { %v3073_v12 = vpop.eup %3072 }
0x1832   :  { %1200 = vrot.lane.b32.xlu0 %v3073_v12, %s3195_s29 }
0x18a2   :  { %v1199_v13 = vpop.permute.xlu1 %1198 }
0x18a3   :  { %v1204_v14 = vmul.f32 %v3067_v60, %v1199_v13 }
0x18a4   :  { %v1201_v15 = vpop.permute.xlu0 %1200 }
0x18a5   :  { %v1205_v16 = vmul.f32 %v3069_v63, %v1201_v15  ;;  %v1206_v17 = vpack.c.bf16 %v1204_v14, %v1204_v14 }
0x18a7   :  { %v1207_v19 = vpack.c.bf16 %v1205_v16, %v1205_v16  ;;  %v1210_v21 = vunpack.c.l.b16 %v1206_v17 }
0x18a9   :  { %v1211_v20 = vunpack.c.l.b16 %v1207_v19 }
0x18ab   :  { %v1212_v22 = vrot.slane %v1211_v20, 7 }
0x18ad   :  { %v1213_v23 = vsel %vm212_vm2, %v1212_v22, %v1210_v21 }
0x18ae   :  { %v1214_v26 = vpack.c.b16 %v1213_v23, %v1213_v23 }
0x18b0   :  { %1215 = vrot.lane.b32.xlu0 %v1214_v26, %s3196_s30 }
0x1922   :  { %v1216_v5 = vpop.permute.xlu0 %1215 }
0x1923   :  { %2801 = vmatmul.mubr.msk.bf16.vlgmr.msra.gmra.mrb[16].mxu1 %vm107_vm3, %v1216_v5 }
0x1924   :  { %2813 = vmatpush3.bf16.msra.mxu1 %v3494_v25  ;;  %2816 = vmatprep.mubr.msk.bf16.mxu1 %vm3193_vm0, %v3192_v0 }
0x1925   :  { %2814 = vmatprep.subr.bf16.mxu1 %v3192_v0 }
0x1928   :  { %2815 = vmatpush3.bf16.msra.mxu1 %v3503_v27 }
0x1929   :  { %2828 = vmatprep.subr.bf16.mxu1 %v3192_v0 }
0x19f6   :  { %v1254_v28 = vpop.f32.mrb[16].mxu1 }
0x19f7   :  { %v1261_v6 = vrot.slane %v1254_v28, 7  ;;  %v1265_v29 = vadd.f32 %v1254_v28, %v3536_v47  ;;  %v2802_v30 = vpop.f32.mrb[17].mxu1 }
0x19f8   :  { %v1257_v31 = vpop.f32.mrb[18].mxu1 }
0x19f9   :  { %v1264_v32 = vadd.f32 %v1261_v6, %v3533_v42  ;;  %3074 = vtanh.f32 %v1265_v29  ;;  %v2803_v33 = vpop.f32.mrb[19].mxu1  ;;  %v2591_v38 = vmul.f32 -1.442695, %v1265_v29 }
0x19fb   :  { %3076 = vtanh.f32 %v1264_v32  ;;  %v2590_v39 = vmul.f32 -1.442695, %v1264_v32 }
0x19fc   :  { %3078 = vpow2.f32 %v2591_v38 }
0x19fd   :  { %3080 = vpow2.f32 %v2590_v39 }
0x1a03   :  { %v3075_v34 = vpop.eup %3074 }
0x1a04   :  { %1292 = vrot.lane.b32.xlu0 %v3075_v34, %s3195_s29 }
0x1a05   :  { %v3077_v36 = vpop.eup %3076 }
0x1a06   :  { %1290 = vrot.lane.b32.xlu1 %v3077_v36, %s3195_s29  ;;  %v3079_v40 = vpop.eup %3078 }
0x1a07   :  { %v3081_v53 = vpop.eup %3080  ;;  %v1273_v49 = vadd.f32 1.0, %v3079_v40 }
0x1a08   :  { %v1272_v35 = vadd.f32 1.0, %v3081_v53 }
0x1a09   :  { %3082 = vrcp.f32 %v1273_v49 }
0x1a0a   :  { %3084 = vrcp.f32 %v1272_v35 }
0x1a13   :  { %v3083_v37 = vpop.eup %3082 }
0x1a14   :  { %v3085_v44 = vpop.eup %3084  ;;  %v1287_v50 = vmul.f32 %v3083_v37, %v1283_v48 }
0x1a15   :  { %v1286_v55 = vmul.f32 %v3085_v44, %v1282_v51 }
0x1a76   :  { %v1293_v41 = vpop.permute.xlu0 %1292 }
0x1a77   :  { %v1297_v43 = vmul.f32 %v3083_v37, %v1293_v41 }
0x1a78   :  { %v1291_v45 = vpop.permute.xlu1 %1290 }
0x1a79   :  { %1302 = vrot.lane.b32.xlu0 %v1297_v43, %s3196_s30  ;;  %v1296_v46 = vmul.f32 %v3085_v44, %v1291_v45 }
0x1a7b   :  { %1300 = vrot.lane.b32.xlu1 %v1296_v46, %s3196_s30 }
0x1aeb   :  { %v1303_v52 = vpop.permute.xlu0 %1302 }
0x1aec   :  { %v3564_v54 = vadd.f32 %v1303_v52, %v1287_v50 }
0x1aed   :  { %v1301_v56 = vpop.permute.xlu1 %1300 }
0x1aee   :  { %3086 = vtanh.f32 %v3564_v54  ;;  %v1306_v57 = vadd.f32 %v1301_v56, %v1286_v55  ;;  %v1398_v38 = vrot.slane %v3564_v54, 7 }
0x1af0   :  { %3088 = vtanh.f32 %v1306_v57  ;;  %v1397_v36 = vrot.slane %v1306_v57, 7 }
0x1af8   :  { %v3087_v58 = vpop.eup %3086 }
0x1af9   :  { %1314 = vrot.lane.b32.xlu0 %v3087_v58, %s3195_s29 }
0x1afa   :  { %v3089_v59 = vpop.eup %3088 }
0x1afb   :  { %1312 = vrot.lane.b32.xlu1 %v3089_v59, %s3195_s29 }
0x1b6b   :  { %v1315_v60 = vpop.permute.xlu0 %1314 }
0x1b6c   :  { %v1319_v61 = vmul.f32 %v3083_v37, %v1315_v60 }
0x1b6d   :  { %v1313_v62 = vpop.permute.xlu1 %1312 }
0x1b6e   :  { %v1318_v63 = vmul.f32 %v3085_v44, %v1313_v62  ;;  %v1321_v1 = vpack.c.bf16 %v1319_v61, %v1319_v61 }
0x1b70   :  { %v1320_v2 = vpack.c.bf16 %v1318_v63, %v1318_v63  ;;  %v1325_v4 = vunpack.c.l.b16 %v1321_v1 }
0x1b72   :  { %v1324_v3 = vunpack.c.l.b16 %v1320_v2 }
0x1b74   :  { %v1326_v8 = vrot.slane %v1324_v3, 1 }
0x1b76   :  { %v1327_v18 = vsel %vm212_vm2, %v1325_v4, %v1326_v8 }
0x1b77   :  { %v1328_v24 = vpack.c.b16 %v1327_v18, %v1327_v18 }
0x1b79   :  { %1329 = vrot.lane.b32.xlu1 %v1328_v24, %s3196_s30 }
0x1beb   :  { %v1330_v10 = vpop.permute.xlu1 %1329 }
0x1bec   :  { %2809 = vmatmul.mubr.msk.bf16.vlgmr.msra.gmra.mrb[28].mxu0 %vm107_vm3, %v1330_v10 }
0x1bed   :  { %2821 = vmatpush3.bf16.msra.mxu0 %v3494_v25  ;;  %2824 = vmatprep.mubr.msk.bf16.mxu0 %vm3193_vm0, %v3192_v0 }
0x1bee   :  { %2822 = vmatprep.subr.bf16.mxu0 %v3192_v0 }
0x1bf1   :  { %2823 = vmatpush3.bf16.msra.mxu0 %v3503_v27 }
0x1bf2   :  { %2836 = vmatprep.subr.bf16.mxu0 %v3192_v0 }
0x1cbf   :  { %v1368_v11 = vpop.f32.mrb[28].mxu0 }
0x1cc0   :  { %v1375_v12 = vrot.slane %v1368_v11, 6  ;;  %v1376_v13 = vrot.slane %v1368_v11, 7  ;;  %v2810_v14 = vpop.f32.mrb[29].mxu0 }
0x1cc1   :  { %v1371_v15 = vpop.f32.mrb[30].mxu0 }
0x1cc2   :  { %v1379_v16 = vadd.f32 %v1375_v12, %v3533_v42  ;;  %v1380_v17 = vadd.f32 %v1376_v13, %v3536_v47  ;;  %v2811_v19 = vpop.f32.mrb[31].mxu0 }
0x1cc4   :  { %3090 = vtanh.f32 %v1379_v16  ;;  %v2593_v22 = vmul.f32 -1.442695, %v1379_v16  ;;  %v2594_v23 = vmul.f32 -1.442695, %v1380_v17 }
0x1cc5   :  { %3092 = vtanh.f32 %v1380_v17 }
0x1cc6   :  { %3094 = vpow2.f32 %v2593_v22 }
0x1cc7   :  { %3096 = vpow2.f32 %v2594_v23 }
0x1cce   :  { %v3091_v20 = vpop.eup %3090 }
0x1ccf   :  { %v3093_v21 = vpop.eup %3092  ;;  %1405 = vrot.lane.b32.xlu0 %v3091_v20, %s3195_s29 }
0x1cd0   :  { %1407 = vrot.lane.b32.xlu1 %v3093_v21, %s3195_s29  ;;  %v3095_v26 = vpop.eup %3094 }
0x1cd1   :  { %v3097_v5 = vpop.eup %3096  ;;  %v1387_v28 = vadd.f32 1.0, %v3095_v26 }
0x1cd2   :  { %v1388_v6 = vadd.f32 1.0, %v3097_v5 }
0x1cd3   :  { %3098 = vrcp.f32 %v1387_v28 }
0x1cd4   :  { %3100 = vrcp.f32 %v1388_v6 }
0x1cdd   :  { %v3099_v29 = vpop.eup %3098 }
0x1cde   :  { %v3101_v31 = vpop.eup %3100  ;;  %v1401_v39 = vmul.f32 %v3099_v29, %v1397_v36 }
0x1cdf   :  { %v1402_v40 = vmul.f32 %v3101_v31, %v1398_v38 }
0x1d41   :  { %v1406_v30 = vpop.permute.xlu0 %1405 }
0x1d42   :  { %v1408_v32 = vpop.permute.xlu1 %1407  ;;  %v1411_v33 = vmul.f32 %v3099_v29, %v1406_v30 }
0x1d43   :  { %v1412_v34 = vmul.f32 %v3101_v31, %v1408_v32 }
0x1d44   :  { %1415 = vrot.lane.b32.xlu0 %v1411_v33, %s3196_s30 }
0x1d45   :  { %1417 = vrot.lane.b32.xlu1 %v1412_v34, %s3196_s30 }
0x1db6   :  { %v1416_v53 = vpop.permute.xlu0 %1415 }
0x1db7   :  { %v1418_v49 = vpop.permute.xlu1 %1417  ;;  %v3585_v35 = vadd.f32 %v1416_v53, %v1401_v39 }
0x1db8   :  { %v3587_v37 = vadd.f32 %v1418_v49, %v1402_v40 }
0x1db9   :  { %3102 = vtanh.f32 %v3585_v35  ;;  %v1513_v22 = vrot.slane %v3585_v35, 7 }
0x1dba   :  { %3104 = vtanh.f32 %v3587_v37  ;;  %v1514_v23 = vrot.slane %v3587_v37, 7 }
0x1dc3   :  { %v3103_v41 = vpop.eup %3102 }
0x1dc4   :  { %v3105_v43 = vpop.eup %3104  ;;  %1427 = vrot.lane.b32.xlu0 %v3103_v41, %s3195_s29 }
0x1dc5   :  { %1429 = vrot.lane.b32.xlu1 %v3105_v43, %s3195_s29 }
0x1e36   :  { %v1428_v44 = vpop.permute.xlu0 %1427 }
0x1e37   :  { %v1430_v45 = vpop.permute.xlu1 %1429  ;;  %v1433_v46 = vmul.f32 %v3099_v29, %v1428_v44 }
0x1e38   :  { %v1434_v48 = vmul.f32 %v3101_v31, %v1430_v45 }
0x1e39   :  { %v1435_v50 = vpack.c.bf16 %v1433_v46, %v1433_v46 }
0x1e3a   :  { %v1436_v51 = vpack.c.bf16 %v1434_v48, %v1434_v48 }
0x1e3b   :  { %v1439_v52 = vunpack.c.l.b16 %v1435_v50 }
0x1e3c   :  { %v1440_v54 = vunpack.c.l.b16 %v1436_v51 }
0x1e3d   :  { %v1441_v55 = vrot.slane %v1439_v52, 2 }
0x1e3e   :  { %v1442_v56 = vrot.slane %v1440_v54, 1 }
0x1e40   :  { %v1443_v57 = vsel %vm212_vm2, %v1442_v56, %v1441_v55 }
0x1e41   :  { %v1444_v58 = vpack.c.b16 %v1443_v57, %v1443_v57 }
0x1e43   :  { %1445 = vrot.lane.b32.xlu0 %v1444_v58, %s3196_s30 }
0x1eb5   :  { %v1446_v59 = vpop.permute.xlu0 %1445 }
0x1eb6   :  { %2817 = vmatmul.mubr.msk.bf16.vlgmr.msra.gmra.mrb[20].mxu1 %vm107_vm3, %v1446_v59 }
0x1eb7   :  { %2829 = vmatpush3.bf16.msra.mxu1 %v3494_v25  ;;  %2832 = vmatprep.mubr.msk.bf16.mxu1 %vm3193_vm0, %v3192_v0 }
0x1eb8   :  { %2830 = vmatprep.subr.bf16.mxu1 %v3192_v0 }
0x1ebb   :  { %2831 = vmatpush3.bf16.msra.mxu1 %v3503_v27 }
0x1ebc   :  { %2844 = vmatprep.subr.bf16.mxu1 %v3192_v0 }
0x1f89   :  { %v1484_v60 = vpop.f32.mrb[20].mxu1 }
0x1f8a   :  { %v1491_v61 = vrot.slane %v1484_v60, 5  ;;  %v1492_v62 = vrot.slane %v1484_v60, 6  ;;  %v2818_v63 = vpop.f32.mrb[21].mxu1 }
0x1f8b   :  { %v1487_v1 = vpop.f32.mrb[22].mxu1 }
0x1f8c   :  { %v1495_v2 = vadd.f32 %v1491_v61, %v3533_v42  ;;  %v1496_v3 = vadd.f32 %v1492_v62, %v3536_v47  ;;  %v2819_v4 = vpop.f32.mrb[23].mxu1 }
0x1f8e   :  { %3106 = vtanh.f32 %v1495_v2  ;;  %v2596_v24 = vmul.f32 -1.442695, %v1495_v2  ;;  %v2597_v10 = vmul.f32 -1.442695, %v1496_v3 }
0x1f8f   :  { %3108 = vtanh.f32 %v1496_v3 }
0x1f90   :  { %3110 = vpow2.f32 %v2596_v24 }
0x1f91   :  { %3112 = vpow2.f32 %v2597_v10 }
0x1f98   :  { %v3107_v8 = vpop.eup %3106 }
0x1f99   :  { %v3109_v18 = vpop.eup %3108  ;;  %1521 = vrot.lane.b32.xlu1 %v3107_v8, %s3195_s29 }
0x1f9a   :  { %1523 = vrot.lane.b32.xlu0 %v3109_v18, %s3195_s29  ;;  %v3111_v11 = vpop.eup %3110 }
0x1f9b   :  { %v3113_v12 = vpop.eup %3112  ;;  %v1503_v13 = vadd.f32 1.0, %v3111_v11 }
0x1f9c   :  { %v1504_v14 = vadd.f32 1.0, %v3113_v12 }
0x1f9d   :  { %3114 = vrcp.f32 %v1503_v13 }
0x1f9e   :  { %3116 = vrcp.f32 %v1504_v14 }
0x1fa7   :  { %v3115_v15 = vpop.eup %3114 }
0x1fa8   :  { %v3117_v17 = vpop.eup %3116  ;;  %v1517_v26 = vmul.f32 %v3115_v15, %v1513_v22 }
0x1fa9   :  { %v1518_v5 = vmul.f32 %v3117_v17, %v1514_v23 }
0x200b   :  { %v1522_v16 = vpop.permute.xlu1 %1521 }
0x200c   :  { %v1524_v19 = vpop.permute.xlu0 %1523  ;;  %v1527_v20 = vmul.f32 %v3115_v15, %v1522_v16 }
0x200d   :  { %v1528_v21 = vmul.f32 %v3117_v17, %v1524_v19 }
0x200e   :  { %1531 = vrot.lane.b32.xlu1 %v1527_v20, %s3196_s30 }
0x200f   :  { %1533 = vrot.lane.b32.xlu0 %v1528_v21, %s3196_s30 }
0x2080   :  { %v1532_v28 = vpop.permute.xlu1 %1531 }
0x2081   :  { %v1534_v6 = vpop.permute.xlu0 %1533  ;;  %v1537_v29 = vadd.f32 %v1532_v28, %v1517_v26 }
0x2082   :  { %v1538_v30 = vadd.f32 %v1534_v6, %v1518_v5 }
0x2083   :  { %3118 = vtanh.f32 %v1537_v29  ;;  %v1629_v24 = vrot.slane %v1537_v29, 7 }
0x2084   :  { %3120 = vtanh.f32 %v1538_v30  ;;  %v1630_v10 = vrot.slane %v1538_v30, 7 }
0x208d   :  { %v3119_v31 = vpop.eup %3118 }
0x208e   :  { %v3121_v32 = vpop.eup %3120  ;;  %1543 = vrot.lane.b32.xlu1 %v3119_v31, %s3195_s29 }
0x208f   :  { %1545 = vrot.lane.b32.xlu0 %v3121_v32, %s3195_s29 }
0x2100   :  { %v1544_v33 = vpop.permute.xlu1 %1543 }
0x2101   :  { %v1546_v34 = vpop.permute.xlu0 %1545  ;;  %v1549_v36 = vmul.f32 %v3115_v15, %v1544_v33 }
0x2102   :  { %v1550_v38 = vmul.f32 %v3117_v17, %v1546_v34 }
0x2103   :  { %v1551_v39 = vpack.c.bf16 %v1549_v36, %v1549_v36 }
0x2104   :  { %v1552_v40 = vpack.c.bf16 %v1550_v38, %v1550_v38 }
0x2105   :  { %v1555_v53 = vunpack.c.l.b16 %v1551_v39 }
0x2106   :  { %v1556_v49 = vunpack.c.l.b16 %v1552_v40 }
0x2107   :  { %v1557_v35 = vrot.slane %v1555_v53, 3 }
0x2108   :  { %v1558_v37 = vrot.slane %v1556_v49, 2 }
0x210a   :  { %v1559_v41 = vsel %vm212_vm2, %v1558_v37, %v1557_v35 }
0x210b   :  { %v1560_v43 = vpack.c.b16 %v1559_v41, %v1559_v41 }
0x210d   :  { %1561 = vrot.lane.b32.xlu1 %v1560_v43, %s3196_s30 }
0x217f   :  { %v1562_v44 = vpop.permute.xlu1 %1561 }
0x2180   :  { %2825 = vmatmul.mubr.msk.bf16.vlgmr.msra.gmra.mrb[32].mxu0 %vm107_vm3, %v1562_v44 }
0x2181   :  { %2837 = vmatpush3.bf16.msra.mxu0 %v3494_v25  ;;  %2840 = vmatprep.mubr.msk.bf16.mxu0 %vm3193_vm0, %v3192_v0 }
0x2182   :  { %2838 = vmatprep.subr.bf16.mxu0 %v3192_v0 }
0x2185   :  { %2839 = vmatpush3.bf16.msra.mxu0 %v3503_v27 }
0x2253   :  { %v1600_v45 = vpop.f32.mrb[32].mxu0 }
0x2254   :  { %v1607_v46 = vrot.slane %v1600_v45, 4  ;;  %v1608_v48 = vrot.slane %v1600_v45, 5  ;;  %v2826_v50 = vpop.f32.mrb[33].mxu0 }
0x2255   :  { %v1603_v51 = vpop.f32.mrb[34].mxu0 }
0x2256   :  { %v1611_v52 = vadd.f32 %v1607_v46, %v3533_v42  ;;  %v1612_v54 = vadd.f32 %v1608_v48, %v3536_v47  ;;  %v2827_v55 = vpop.f32.mrb[35].mxu0 }
0x2258   :  { %3122 = vtanh.f32 %v1611_v52  ;;  %v2599_v58 = vmul.f32 -1.442695, %v1611_v52  ;;  %v2600_v59 = vmul.f32 -1.442695, %v1612_v54 }
0x2259   :  { %3124 = vtanh.f32 %v1612_v54 }
0x225a   :  { %3126 = vpow2.f32 %v2599_v58 }
0x225b   :  { %3128 = vpow2.f32 %v2600_v59 }
0x2262   :  { %v3123_v56 = vpop.eup %3122 }
0x2263   :  { %v3125_v57 = vpop.eup %3124  ;;  %1637 = vrot.lane.b32.xlu0 %v3123_v56, %s3195_s29 }
0x2264   :  { %1639 = vrot.lane.b32.xlu1 %v3125_v57, %s3195_s29  ;;  %v3127_v60 = vpop.eup %3126 }
0x2265   :  { %v3129_v61 = vpop.eup %3128  ;;  %v1619_v62 = vadd.f32 1.0, %v3127_v60 }
0x2266   :  { %v1620_v63 = vadd.f32 1.0, %v3129_v61 }
0x2267   :  { %3130 = vrcp.f32 %v1619_v62 }
0x2268   :  { %3132 = vrcp.f32 %v1620_v63 }
0x2271   :  { %v3131_v1 = vpop.eup %3130 }
0x2272   :  { %v3133_v3 = vpop.eup %3132  ;;  %v1633_v11 = vmul.f32 %v3131_v1, %v1629_v24 }
0x2273   :  { %v1634_v12 = vmul.f32 %v3133_v3, %v1630_v10 }
0x22d5   :  { %v1638_v2 = vpop.permute.xlu0 %1637 }
0x22d6   :  { %v1640_v4 = vpop.permute.xlu1 %1639  ;;  %v1643_v8 = vmul.f32 %v3131_v1, %v1638_v2 }
0x22d7   :  { %v1644_v18 = vmul.f32 %v3133_v3, %v1640_v4 }
0x22d8   :  { %1647 = vrot.lane.b32.xlu0 %v1643_v8, %s3196_s30 }
0x22d9   :  { %1649 = vrot.lane.b32.xlu1 %v1644_v18, %s3196_s30 }
0x234a   :  { %v1648_v13 = vpop.permute.xlu0 %1647 }
0x234b   :  { %v1650_v14 = vpop.permute.xlu1 %1649  ;;  %v1653_v15 = vadd.f32 %v1648_v13, %v1633_v11 }
0x234c   :  { %v1654_v16 = vadd.f32 %v1650_v14, %v1634_v12 }
0x234d   :  { %3134 = vtanh.f32 %v1653_v15  ;;  %v1745_v55 = vrot.slane %v1653_v15, 7 }
0x234e   :  { %3136 = vtanh.f32 %v1654_v16  ;;  %v1746_v56 = vrot.slane %v1654_v16, 7 }
0x2357   :  { %v3135_v17 = vpop.eup %3134 }
0x2358   :  { %v3137_v19 = vpop.eup %3136  ;;  %1659 = vrot.lane.b32.xlu0 %v3135_v17, %s3195_s29 }
0x2359   :  { %1661 = vrot.lane.b32.xlu1 %v3137_v19, %s3195_s29 }
0x23ca   :  { %v1660_v20 = vpop.permute.xlu0 %1659 }
0x23cb   :  { %v1662_v21 = vpop.permute.xlu1 %1661  ;;  %v1665_v22 = vmul.f32 %v3131_v1, %v1660_v20 }
0x23cc   :  { %v1666_v23 = vmul.f32 %v3133_v3, %v1662_v21 }
0x23cd   :  { %v1667_v26 = vpack.c.bf16 %v1665_v22, %v1665_v22 }
0x23ce   :  { %v1668_v5 = vpack.c.bf16 %v1666_v23, %v1666_v23 }
0x23cf   :  { %v1671_v28 = vunpack.c.l.b16 %v1667_v26 }
0x23d0   :  { %v1672_v6 = vunpack.c.l.b16 %v1668_v5 }
0x23d1   :  { %v1673_v29 = vrot.slane %v1671_v28, 4 }
0x23d2   :  { %v1674_v30 = vrot.slane %v1672_v6, 3 }
0x23d4   :  { %v1675_v31 = vsel %vm212_vm2, %v1674_v30, %v1673_v29 }
0x23d5   :  { %v1676_v32 = vpack.c.b16 %v1675_v31, %v1675_v31 }
0x23d7   :  { %1677 = vrot.lane.b32.xlu0 %v1676_v32, %s3196_s30 }
0x2449   :  { %v1678_v33 = vpop.permute.xlu0 %1677 }
0x244a   :  { %2833 = vmatmul.mubr.msk.bf16.vlgmr.msra.gmra.mrb[24].mxu1 %vm107_vm3, %v1678_v33 }
0x244b   :  { %2845 = vmatpush3.bf16.msra.mxu1 %v3494_v25  ;;  %2848 = vmatprep.mubr.msk.bf16.mxu1 %vm3193_vm0, %v3192_v0  ;;  %vm2412_vm0 = vcmask 457728  }
0x244c   :  { %2846 = vmatprep.subr.bf16.mxu1 %v3192_v0 }
0x244f   :  { %2847 = vmatpush3.bf16.msra.mxu1 %v3503_v27 }
0x251d   :  { %v1716_v34 = vpop.f32.mrb[24].mxu1 }
0x251e   :  { %v1723_v36 = vrot.slane %v1716_v34, 3  ;;  %v1724_v38 = vrot.slane %v1716_v34, 4  ;;  %v2834_v39 = vpop.f32.mrb[25].mxu1 }
0x251f   :  { %v1719_v40 = vpop.f32.mrb[26].mxu1 }
0x2520   :  { %v1727_v53 = vadd.f32 %v1723_v36, %v3533_v42  ;;  %v1728_v49 = vadd.f32 %v1724_v38, %v3536_v47  ;;  %v2835_v35 = vpop.f32.mrb[27].mxu1 }
0x2522   :  { %3138 = vtanh.f32 %v1727_v53  ;;  %v2602_v0 = vmul.f32 -1.442695, %v1727_v53  ;;  %v2603_v27 = vmul.f32 -1.442695, %v1728_v49 }
0x2523   :  { %3140 = vtanh.f32 %v1728_v49 }
0x2524   :  { %3142 = vpow2.f32 %v2602_v0 }
0x2525   :  { %3144 = vpow2.f32 %v2603_v27 }
0x252c   :  { %v3139_v25 = vpop.eup %3138 }
0x252d   :  { %v3141_v37 = vpop.eup %3140  ;;  %1753 = vrot.lane.b32.xlu1 %v3139_v25, %s3195_s29 }
0x252e   :  { %1755 = vrot.lane.b32.xlu0 %v3141_v37, %s3195_s29  ;;  %v3143_v41 = vpop.eup %3142 }
0x252f   :  { %v3145_v43 = vpop.eup %3144  ;;  %v1735_v44 = vadd.f32 1.0, %v3143_v41 }
0x2530   :  { %v1736_v45 = vadd.f32 1.0, %v3145_v43 }
0x2531   :  { %3146 = vrcp.f32 %v1735_v44 }
0x2532   :  { %3148 = vrcp.f32 %v1736_v45 }
0x253b   :  { %v3147_v46 = vpop.eup %3146 }
0x253c   :  { %v3149_v50 = vpop.eup %3148  ;;  %v1749_v57 = vmul.f32 %v3147_v46, %v1745_v55 }
0x253d   :  { %v1750_v58 = vmul.f32 %v3149_v50, %v1746_v56 }
0x259f   :  { %v1754_v48 = vpop.permute.xlu1 %1753 }
0x25a0   :  { %v1756_v51 = vpop.permute.xlu0 %1755  ;;  %v1759_v52 = vmul.f32 %v3147_v46, %v1754_v48 }
0x25a1   :  { %v1760_v54 = vmul.f32 %v3149_v50, %v1756_v51 }
0x25a2   :  { %1763 = vrot.lane.b32.xlu1 %v1759_v52, %s3196_s30 }
0x25a3   :  { %1765 = vrot.lane.b32.xlu0 %v1760_v54, %s3196_s30 }
0x2614   :  { %v1764_v59 = vpop.permute.xlu1 %1763 }
0x2615   :  { %v1766_v60 = vpop.permute.xlu0 %1765  ;;  %v1769_v61 = vadd.f32 %v1764_v59, %v1749_v57 }
0x2616   :  { %v1770_v62 = vadd.f32 %v1766_v60, %v1750_v58 }
0x2617   :  { %3150 = vtanh.f32 %v1769_v61  ;;  %v1861_v35 = vrot.slane %v1769_v61, 7 }
0x2618   :  { %3152 = vtanh.f32 %v1770_v62  ;;  %v1862_v25 = vrot.slane %v1770_v62, 7 }
0x2621   :  { %v3151_v63 = vpop.eup %3150 }
0x2622   :  { %v3153_v1 = vpop.eup %3152  ;;  %1775 = vrot.lane.b32.xlu1 %v3151_v63, %s3195_s29 }
0x2623   :  { %1777 = vrot.lane.b32.xlu0 %v3153_v1, %s3195_s29 }
0x2694   :  { %v1776_v2 = vpop.permute.xlu1 %1775 }
0x2695   :  { %v1778_v3 = vpop.permute.xlu0 %1777  ;;  %v1781_v4 = vmul.f32 %v3147_v46, %v1776_v2 }
0x2696   :  { %v1782_v8 = vmul.f32 %v3149_v50, %v1778_v3 }
0x2697   :  { %v1783_v18 = vpack.c.bf16 %v1781_v4, %v1781_v4 }
0x2698   :  { %v1784_v24 = vpack.c.bf16 %v1782_v8, %v1782_v8 }
0x2699   :  { %v1787_v10 = vunpack.c.l.b16 %v1783_v18 }
0x269a   :  { %v1788_v11 = vunpack.c.l.b16 %v1784_v24 }
0x269b   :  { %v1789_v12 = vrot.slane %v1787_v10, 5 }
0x269c   :  { %v1790_v13 = vrot.slane %v1788_v11, 4 }
0x269e   :  { %v1791_v14 = vsel %vm212_vm2, %v1790_v13, %v1789_v12 }
0x269f   :  { %v1792_v15 = vpack.c.b16 %v1791_v14, %v1791_v14 }
0x26a1   :  { %1793 = vrot.lane.b32.xlu1 %v1792_v15, %s3196_s30 }
0x2713   :  { %v1794_v16 = vpop.permute.xlu1 %1793 }
0x2714   :  { %2841 = vmatmul.mubr.msk.bf16.vlgmr.msra.gmra.mrb[36].mxu0 %vm107_vm3, %v1794_v16 }
0x2715   :  { %2077 = vmatprep.mubr.bf16.mxu0 %v3194_v7 }
0x27e7   :  { %v1832_v17 = vpop.f32.mrb[36].mxu0 }
0x27e8   :  { %v1839_v19 = vrot.slane %v1832_v17, 2  ;;  %v1840_v20 = vrot.slane %v1832_v17, 3  ;;  %v2842_v21 = vpop.f32.mrb[37].mxu0 }
0x27e9   :  { %v1835_v22 = vpop.f32.mrb[38].mxu0 }
0x27ea   :  { %v1843_v23 = vadd.f32 %v1839_v19, %v3533_v42  ;;  %v1844_v26 = vadd.f32 %v1840_v20, %v3536_v47  ;;  %v2843_v5 = vpop.f32.mrb[39].mxu0 }
0x27ec   :  { %3154 = vtanh.f32 %v1843_v23  ;;  %v2605_v29 = vmul.f32 -1.442695, %v1843_v23  ;;  %v2606_v30 = vmul.f32 -1.442695, %v1844_v26 }
0x27ed   :  { %3156 = vtanh.f32 %v1844_v26 }
0x27ee   :  { %3158 = vpow2.f32 %v2605_v29 }
0x27ef   :  { %3160 = vpow2.f32 %v2606_v30 }
0x27f6   :  { %v3155_v28 = vpop.eup %3154 }
0x27f7   :  { %v3157_v6 = vpop.eup %3156  ;;  %1869 = vrot.lane.b32.xlu0 %v3155_v28, %s3195_s29 }
0x27f8   :  { %1871 = vrot.lane.b32.xlu1 %v3157_v6, %s3195_s29  ;;  %v3159_v31 = vpop.eup %3158 }
0x27f9   :  { %v3161_v32 = vpop.eup %3160  ;;  %v1851_v33 = vadd.f32 1.0, %v3159_v31 }
0x27fa   :  { %v1852_v34 = vadd.f32 1.0, %v3161_v32 }
0x27fb   :  { %3162 = vrcp.f32 %v1851_v33 }
0x27fc   :  { %3164 = vrcp.f32 %v1852_v34  ;;  %v2019_v34 = vld [vmem:[%s3813_s3 + $0x20] sm:$0x33] }
0x2805   :  { %v3163_v36 = vpop.eup %3162 }
0x2806   :  { %v3165_v39 = vpop.eup %3164  ;;  %v1865_v37 = vmul.f32 %v3163_v36, %v1861_v35 }
0x2807   :  { %v1866_v0 = vmul.f32 %v3165_v39, %v1862_v25  ;;  %v2879_v25 = vld [vmem:[%s3813_s3 + $0x14] ss:$8 sps:$4 sm:$0xff]  }
0x2869   :  { %v1870_v38 = vpop.permute.xlu0 %1869 }
0x286a   :  { %v1872_v40 = vpop.permute.xlu1 %1871  ;;  %v1875_v53 = vmul.f32 %v3163_v36, %v1870_v38  ;;  %v2611_v38 = vcombine.high %v2019_v34, %v2019_v34 }
0x286b   :  { %v1876_v49 = vmul.f32 %v3165_v39, %v1872_v40  ;;  %v2876_v40 = vld [vmem:[%s3813_s3 + $0x4] ss:$8 sps:$4 sm:$0xff]  }
0x286c   :  { %1879 = vrot.lane.b32.xlu0 %v1875_v53, %s3196_s30  ;;  %v2874_v53 = vld [vmem:[%s3813_s3] ss:$8 sps:$4 sm:$0xff]   ;;  %2612 = vmatprep.subr.msk.bf16.mxu0 %vm1018_vm5, %v2611_v38 }
0x286d   :  { %1881 = vrot.lane.b32.xlu1 %v1876_v49, %s3196_s30 }
0x28de   :  { %v1880_v27 = vpop.permute.xlu0 %1879 }
0x28df   :  { %v1882_v41 = vpop.permute.xlu1 %1881  ;;  %v1885_v43 = vadd.f32 %v1880_v27, %v1865_v37  ;;  %v2877_v37 = vld [vmem:[%s3813_s3 + $0x10] ss:$8 sps:$4 sm:$0xff]  }
0x28e0   :  { %v1886_v44 = vadd.f32 %v1882_v41, %v1866_v0  ;;  %v2880_v27 = vld [vmem:[%s3813_s3 + $0x30] ss:$8 sps:$4 sm:$0xff]   ;;  %v2882_v41 = vld [vmem:[%s3813_s3 + $0x34] ss:$8 sps:$4 sm:$0xff]  }
0x28e1   :  { %3166 = vtanh.f32 %v1885_v43  ;;  %v1977_v23 = vrot.slane %v1885_v43, 7  ;;  %2322 = vmatprep.subr.bf16.mxu1 %v2882_v41  ;;  %v2196_v41 = vsub.s32 3, %v3273_v9 }
0x28e2   :  { %3168 = vtanh.f32 %v1886_v44  ;;  %v1978_v26 = vrot.slane %v1886_v44, 7 }
0x28eb   :  { %v3167_v45 = vpop.eup %3166 }
0x28ec   :  { %v3169_v46 = vpop.eup %3168  ;;  %1891 = vrot.lane.b32.xlu0 %v3167_v45, %s3195_s29  ;;  %v2885_v45 = vld [vmem:[%s3813_s3 + $0x44] ss:$8 sps:$4 sm:$0xff]  }
0x28ed   :  { %1893 = vrot.lane.b32.xlu1 %v3169_v46, %s3195_s29 }
0x295e   :  { %v1892_v48 = vpop.permute.xlu0 %1891 }
0x295f   :  { %v1894_v50 = vpop.permute.xlu1 %1893  ;;  %v1897_v51 = vmul.f32 %v3163_v36, %v1892_v48  ;;  %v2020_v36 = vld [vmem:[%s3814_s1] sm:$0x3] }
0x2960   :  { %v1898_v52 = vmul.f32 %v3165_v39, %v1894_v50  ;;  %v2610_v39 = vcombine.low %v2019_v34, %v2019_v34  ;;  %v2021_v35 = vpack.c.bf16 %v2020_v36, %v2020_v36  ;;  %v2883_v50 = vld [vmem:[%s3813_s3 + $0x40] ss:$8 sps:$4 sm:$0xff]  }
0x2961   :  { %v1899_v54 = vpack.c.bf16 %v1897_v51, %v1897_v51 }
0x2962   :  { %v1900_v55 = vpack.c.bf16 %v1898_v52, %v1898_v52  ;;  %v2040_v49 = vsel %vm1018_vm5, %v2610_v39, 0  ;;  %v2888_v52 = vld [vmem:[%s3813_s3 + $0x54] ss:$8 sps:$4 sm:$0xff]  }
0x2963   :  { %v1903_v56 = vunpack.c.l.b16 %v1899_v54  ;;  %2046 = vmatpush1.bf16.msra.mxu0 %v2040_v49  ;;  %v2924_v49 = vld [vmem:[%s3813_s3 + $0x114] ss:$8 sps:$4 sm:$0xff]  }
0x2964   :  { %v1904_v57 = vunpack.c.l.b16 %v1900_v55  ;;  %2121 = vmatprep.subr.bf16.mxu0 %v2876_v40 }
0x2965   :  { %v1905_v58 = vrot.slane %v1903_v56, 6 }
0x2966   :  { %v1906_v59 = vrot.slane %v1904_v57, 5  ;;  %2613 = vmatmul.mubr.msk.bf16.vlgmr.msra.gmra.mrb[40].mxu0 %vm2035_vm11, %v2021_v35  ;;  %v2886_v57 = vld [vmem:[%s3813_s3 + $0x50] ss:$8 sps:$4 sm:$0xff]  }
0x2967   :  { %2122 = vmatpush1.bf16.msra.mxu0 %v2874_v53  ;;  %2153 = vmatprep.mubr.bf16.mxu0 %v3194_v7  ;;  %v2922_v35 = vld [vmem:[%s3813_s3 + $0x110] ss:$8 sps:$4 sm:$0xff]  }
0x2968   :  { %v1907_v60 = vsel %vm212_vm2, %v1906_v59, %v1905_v58  ;;  %2123 = vmatprep.subr.bf16.mxu0 %v2879_v25  ;;  %v2891_v59 = vld [vmem:[%s3813_s3 + $0x64] ss:$8 sps:$4 sm:$0xff]  }
0x2969   :  { %v1908_v61 = vpack.c.b16 %v1907_v60, %v1907_v60  ;;  %v2371_v25 = vld [vmem:[%s3813_s3 + $0x120] sm:$0xff] }
0x296b   :  { %1909 = vrot.lane.b32.xlu0 %v1908_v61, %s3196_s30  ;;  %2124 = vmatpush1.bf16.msra.mxu0 %v2877_v37  ;;  %v2651_v37 = vcombine.high %v2371_v25, %v2371_v25 }
0x29dd   :  { %v1910_v62 = vpop.permute.xlu0 %1909 }
0x29de   :  { %2849 = vmatmul.mubr.msk.bf16.vlgmr.msra.gmra.mrb[28].mxu1 %vm107_vm3, %v1910_v62  ;;  %v2889_v62 = vld [vmem:[%s3813_s3 + $0x60] ss:$8 sps:$4 sm:$0xff]  }
0x29df   :  { %2323 = vmatpush1.bf16.msra.mxu1 %v2880_v27 }
0x29e0   :  { %2324 = vmatprep.subr.bf16.mxu1 %v2885_v45 }
0x29e3   :  { %2325 = vmatpush1.bf16.msra.mxu1 %v2883_v50 }
0x29e4   :  { %2326 = vmatprep.subr.bf16.mxu1 %v2888_v52 }
0x29e7   :  { %2327 = vmatpush1.bf16.msra.mxu1 %v2886_v57  ;;  %v2375_v57 = vsub.s32 4, %v3273_v9 }
0x29e8   :  { %2328 = vmatprep.subr.bf16.mxu1 %v2891_v59 }
0x29eb   :  { %2329 = vmatpush1.bf16.msra.mxu1 %v2889_v62 }
0x2ab1   :  { %v1948_v63 = vpop.f32.mrb[28].mxu1 }
0x2ab2   :  { %v1955_v1 = vrot.slane %v1948_v63, 1  ;;  %v1956_v2 = vrot.slane %v1948_v63, 2  ;;  %v2850_v3 = vpop.f32.mrb[29].mxu1  ;;  %v2894_v63 = vld [vmem:[%s3813_s3 + $0x74] ss:$8 sps:$4 sm:$0xff]  }
0x2ab3   :  { %v1951_v4 = vpop.f32.mrb[30].mxu1  ;;  %2330 = vmatprep.subr.bf16.mxu1 %v2894_v63  ;;  %v2895_v3 = vld [vmem:[%s3813_s3 + $0x80] ss:$8 sps:$4 sm:$0xff]  }
0x2ab4   :  { %v1959_v8 = vadd.f32 %v1955_v1, %v3533_v42  ;;  %v1960_v18 = vadd.f32 %v1956_v2, %v3536_v47  ;;  %v2851_v24 = vpop.f32.mrb[31].mxu1  ;;  %v2892_v1 = vld [vmem:[%s3813_s3 + $0x70] ss:$8 sps:$4 sm:$0xff]   ;;  %v2897_v2 = vld [vmem:[%s3813_s3 + $0x84] ss:$8 sps:$4 sm:$0xff]  }
0x2ab5   :  { %2331 = vmatpush1.bf16.msra.mxu1 %v2892_v1  ;;  %v2900_v4 = vld [vmem:[%s3813_s3 + $0x94] ss:$8 sps:$4 sm:$0xff]   ;;  %v2901_v24 = vld [vmem:[%s3813_s3 + $0xa0] ss:$8 sps:$4 sm:$0xff]  }
0x2ab6   :  { %3170 = vtanh.f32 %v1959_v8  ;;  %v2608_v12 = vmul.f32 -1.442695, %v1959_v8  ;;  %v2609_v13 = vmul.f32 -1.442695, %v1960_v18  ;;  %2332 = vmatprep.subr.bf16.mxu1 %v2897_v2  ;;  %v2898_v8 = vld [vmem:[%s3813_s3 + $0x90] ss:$8 sps:$4 sm:$0xff]  }
0x2ab7   :  { %3172 = vtanh.f32 %v1960_v18  ;;  %v2903_v18 = vld [vmem:[%s3813_s3 + $0xa4] ss:$8 sps:$4 sm:$0xff]  }
0x2ab8   :  { %3174 = vpow2.f32 %v2608_v12  ;;  %v2909_v12 = vld [vmem:[%s3813_s3 + $0xc4] ss:$8 sps:$4 sm:$0xff]  }
0x2ab9   :  { %3176 = vpow2.f32 %v2609_v13  ;;  %2333 = vmatpush1.bf16.msra.mxu1 %v2895_v3  ;;  %v2907_v13 = vld [vmem:[%s3813_s3 + $0xc0] ss:$8 sps:$4 sm:$0xff]   ;;  %v2470_v3 = vsub.s32 5, %v3273_v9 }
0x2aba   :  { %2334 = vmatprep.subr.bf16.mxu1 %v2900_v4 }
0x2abd   :  { %2335 = vmatpush1.bf16.msra.mxu1 %v2898_v8 }
0x2abe   :  { %2336 = vmatprep.subr.bf16.mxu1 %v2903_v18 }
0x2ac0   :  { %v3171_v10 = vpop.eup %3170 }
0x2ac1   :  { %v3173_v11 = vpop.eup %3172  ;;  %1985 = vrot.lane.b32.xlu1 %v3171_v10, %s3195_s29  ;;  %v2906_v10 = vld [vmem:[%s3813_s3 + $0xb4] ss:$8 sps:$4 sm:$0xff]   ;;  %2337 = vmatpush1.bf16.msra.mxu1 %v2901_v24 }
0x2ac2   :  { %1987 = vrot.lane.b32.xlu0 %v3173_v11, %s3195_s29  ;;  %v3175_v14 = vpop.eup %3174  ;;  %v2904_v11 = vld [vmem:[%s3813_s3 + $0xb0] ss:$8 sps:$4 sm:$0xff]   ;;  %2338 = vmatprep.subr.bf16.mxu1 %v2906_v10 }
0x2ac3   :  { %v3177_v15 = vpop.eup %3176  ;;  %v1967_v16 = vadd.f32 1.0, %v3175_v14 }
0x2ac4   :  { %v1968_v17 = vadd.f32 1.0, %v3177_v15  ;;  %v2912_v15 = vld [vmem:[%s3813_s3 + $0xd4] ss:$8 sps:$4 sm:$0xff]  }
0x2ac5   :  { %3178 = vrcp.f32 %v1967_v16  ;;  %2339 = vmatpush1.bf16.msra.mxu1 %v2904_v11  ;;  %v2910_v16 = vld [vmem:[%s3813_s3 + $0xd0] ss:$8 sps:$4 sm:$0xff]  }
0x2ac6   :  { %3180 = vrcp.f32 %v1968_v17  ;;  %2340 = vmatprep.subr.bf16.mxu1 %v2909_v12  ;;  %v2915_v17 = vld [vmem:[%s3813_s3 + $0xe4] ss:$8 sps:$4 sm:$0xff]  }
0x2ac9   :  { %2341 = vmatpush1.bf16.msra.mxu1 %v2907_v13 }
0x2aca   :  { %2342 = vmatprep.subr.bf16.mxu1 %v2912_v15 }
0x2acd   :  { %2343 = vmatpush1.bf16.msra.mxu1 %v2910_v16 }
0x2ace   :  { %2344 = vmatprep.subr.bf16.mxu1 %v2915_v17 }
0x2acf   :  { %v3179_v42 = vpop.eup %3178 }
0x2ad0   :  { %v3181_v19 = vpop.eup %3180  ;;  %v1981_v5 = vmul.f32 %v3179_v42, %v1977_v23  ;;  %v22_v23 = vld [vmem:[%s3812_s4 + $0x8] sm:$0xff] }
0x2ad1   :  { %v1982_v28 = vmul.f32 %v3181_v19, %v1978_v26  ;;  %v3191_v26 = vld [vmem:[%s3812_s4] sm:$0xff] }
0x2ad2   :  { %v2471_v4 = vrot.slane %v3191_v26, %v2470_v3 }
0x2b33   :  { %v1986_v47 = vpop.permute.xlu1 %1985 }
0x2b34   :  { %v1988_v20 = vpop.permute.xlu0 %1987  ;;  %v1991_v21 = vmul.f32 %v3179_v42, %v1986_v47  ;;  %v2916_v47 = vld [vmem:[%s3813_s3 + $0xf0] ss:$8 sps:$4 sm:$0xff]  }
0x2b35   :  { %v1992_v22 = vmul.f32 %v3181_v19, %v1988_v20  ;;  %v2921_v20 = vld [vmem:[%s3813_s3 + $0x104] ss:$8 sps:$4 sm:$0xff]  }
0x2b36   :  { %1995 = vrot.lane.b32.xlu1 %v1991_v21, %s3196_s30  ;;  %v2919_v21 = vld [vmem:[%s3813_s3 + $0x100] ss:$8 sps:$4 sm:$0xff]  }
0x2b37   :  { %1997 = vrot.lane.b32.xlu0 %v1992_v22, %s3196_s30  ;;  %v2024_v22 = vsub.s32 2, %v3273_v9 }
0x2ba8   :  { %v1996_v6 = vpop.permute.xlu1 %1995 }
0x2ba9   :  { %v1998_v29 = vpop.permute.xlu0 %1997  ;;  %v2001_v30 = vadd.f32 %v1996_v6, %v1981_v5  ;;  %v2025_v5 = vrot.slane %v3191_v26, %v2024_v22 }
0x2baa   :  { %v2002_v31 = vadd.f32 %v1998_v29, %v1982_v28  ;;  %v2029_v28 = vrot.slane %v22_v23, %v2024_v22 }
0x2bab   :  { %3182 = vtanh.f32 %v2001_v30 }
0x2bac   :  { %3184 = vtanh.f32 %v2002_v31 }
0x2bb5   :  { %v3183_v32 = vpop.eup %3182 }
0x2bb6   :  { %v3185_v33 = vpop.eup %3184  ;;  %2007 = vrot.lane.b32.xlu1 %v3183_v32, %s3195_s29 }
0x2bb7   :  { %2009 = vrot.lane.b32.xlu0 %v3185_v33, %s3195_s29 }
0x2c28   :  { %v2008_v0 = vpop.permute.xlu1 %2007 }
0x2c29   :  { %v2010_v43 = vpop.permute.xlu0 %2009  ;;  %v2013_v44 = vmul.f32 %v3179_v42, %v2008_v0  ;;  %v2913_v42 = vld [vmem:[%s3813_s3 + $0xe0] ss:$8 sps:$4 sm:$0xff]   ;;  %v2650_v0 = vcombine.low %v2371_v25, %v2371_v25 }
0x2c2a   :  { %v2014_v46 = vmul.f32 %v3181_v19, %v2010_v43  ;;  %2345 = vmatpush1.bf16.msra.mxu1 %v2913_v42  ;;  %v2918_v19 = vld [vmem:[%s3813_s3 + $0xf4] ss:$8 sps:$4 sm:$0xff]   ;;  %v2197_v43 = vrot.slane %v3191_v26, %v2196_v41 }
0x2c2b   :  { %v2086_v48 = vpack.c.bf16 %v2013_v44, %v2013_v44  ;;  %2422 = vmatprep.subr.bf16.mxu0 %v2918_v19  ;;  %v2417_v27 = vsel %vm1024_vm7, %v2650_v0, 0 }
0x2c2c   :  { %v2087_v51 = vpack.c.bf16 %v2014_v46, %v2014_v46 }
0x2c2d   :  { %v2090_v54 = vunpack.c.l.b16 %v2086_v48 }
0x2c2e   :  { %v2091_v55 = vunpack.c.l.b16 %v2087_v51 }
0x2c2f   :  { %v2092_v56 = vrot.slane %v2090_v54, 7 }
0x2c30   :  { %v2093_v58 = vrot.slane %v2091_v55, 6  ;;  %v2929_v55 = vld [vmem:[%s3813_s3 + $0x134] ss:$8 sps:$4 sm:$0xff]  }
0x2c32   :  { %v2094_v60 = vsel %vm212_vm2, %v2093_v58, %v2092_v56  ;;  %v2927_v56 = vld [vmem:[%s3813_s3 + $0x130] ss:$8 sps:$4 sm:$0xff]   ;;  %v2376_v58 = vrot.slane %v3191_v26, %v2375_v57  ;;  %s3197_s3 = smov 100  }
0x2c33   :  { %v2095_v61 = vpack.c.b16 %v2094_v60, %v2094_v60 }
0x2c35   :  { %2096 = vrot.lane.b32.xlu1 %v2095_v61, %s3196_s30 }
0x2ca7   :  { %v2097_v14 = vpop.permute.xlu1 %2096 }
0x2ca8   :  { %2618 = vmatmul.mubr.msk.bf16.vlgmr.msra.gmra.mrb[40].mxu0 %vm107_vm3, %v2097_v14  ;;  %vm2525_vm3 = vcmask 25600  }
0x2ca9   :  { %2454 = vmatprep.mubr.bf16.mxu0 %v3194_v7  ;;  %2423 = vmatpush1.bf16.msra.mxu0 %v2916_v47 }
0x2caa   :  { %2424 = vmatprep.subr.bf16.mxu0 %v2921_v20 }
0x2cad   :  { %2425 = vmatpush1.bf16.msra.mxu0 %v2919_v21 }
0x2cae   :  { %2426 = vmatprep.subr.bf16.mxu0 %v2924_v49 }
0x2cb1   :  { %2427 = vmatpush1.bf16.msra.mxu0 %v2922_v35 }
0x2cb2   :  { %2652 = vmatprep.subr.msk.bf16.mxu0 %vm1024_vm7, %v2651_v37 }
0x2cb5   :  { %2429 = vmatpush1.bf16.msra.mxu0 %v2417_v27 }
0x2cb6   :  { %2485 = vmatprep.subr.bf16.mxu0 %v2929_v55 }
0x2d7b   :  { %v2155_v6 = vpop.f32.mrb[40].mxu0 }
0x2d7c   :  { %v2852_v29 = vadd.f32 %v2155_v6, %v2025_v5  ;;  %v2157_v30 = vpop.f32.mrb[41].mxu0 }
0x2d7d   :  { %v2853_v31 = vadd.f32 %v2157_v30, %v2029_v28  ;;  %v2159_v32 = vpop.f32.mrb[42].mxu0 }
0x2d7e   :  { %vm2162_vm12 = vcmp.gt.f32.partialorder %v2852_v29, 0.0  ;;  %v2164_v33 = vmul.f32 0.01, %v2852_v29  ;;  %v2160_v34 = vpop.f32.mrb[43].mxu0 }
0x2d7f   :  { %vm2163_vm13 = vcmp.gt.f32.partialorder %v2853_v31, 0.0  ;;  %v2165_v36 = vmul.f32 0.01, %v2853_v31 }
0x2d80   :  { %v2166_v38 = vsel %vm2162_vm12, %v2852_v29, %v2164_v33 }
0x2d81   :  { %v2167_v39 = vsel %vm2163_vm13, %v2853_v31, %v2165_v36  ;;  %v2192_v53 = vpack.c.bf16 %v2166_v38, %v2166_v38 }
0x2d82   :  { %v2193_v40 = vpack.c.bf16 %v2167_v39, %v2167_v39 }
0x2d84   :  { %2643 = vmatprep.mubr.msk.bf16.mxu1 %vm2318_vm14, %v2193_v40 }
0x2d85   :  { %2355 = vmatmul.mubr.bf16.vlgmr.msra.gmra.mrb[32].mxu1 %v2192_v53 }
0x2e58   :  { %v2356_v44 = vpop.f32.mrb[32].mxu1 }
0x2e59   :  { %v2357_v45 = vadd.f32 %v2356_v44, %v2197_v43  ;;  %v2358_v46 = vpop.f32.mrb[33].mxu1 }
0x2e5a   :  { %v2359_v48 = vpop.f32.mrb[34].mxu1 }
0x2e5b   :  { %vm2362_vm15 = vcmp.gt.f32.partialorder %v2357_v45, 0.0  ;;  %v2363_v50 = vmul.f32 0.01, %v2357_v45  ;;  %v2360_v51 = vpop.f32.mrb[35].mxu1 }
0x2e5d   :  { %v2364_v52 = vsel %vm2362_vm15, %v2357_v45, %v2363_v50 }
0x2e5e   :  { %v2372_v54 = vpack.c.bf16 %v2364_v52, %v2364_v52 }
0x2e60   :  { %2653 = vmatmul.mubr.msk.bf16.vlgmr.msra.gmra.mrb[44].mxu0 %vm2412_vm0, %v2372_v54 }
0x2e61   :  { %2517 = vmatprep.mubr.bf16.mxu0 %v3194_v7  ;;  %2486 = vmatpush1.bf16.msra.mxu0 %v2927_v56 }
0x2f33   :  { %v2456_v59 = vpop.f32.mrb[44].mxu0 }
0x2f34   :  { %v2457_v60 = vadd.f32 %v2456_v59, %v2376_v58  ;;  %v2458_v61 = vpop.f32.mrb[45].mxu0 }
0x2f35   :  { %v2459_v62 = vpop.f32.mrb[46].mxu0 }
0x2f36   :  { %vm2462_vm2 = vcmp.gt.f32.partialorder %v2457_v60, 0.0  ;;  %v2463_v63 = vmul.f32 0.01, %v2457_v60  ;;  %v2460_v7 = vpop.f32.mrb[47].mxu0 }
0x2f38   :  { %v2464_v1 = vsel %vm2462_vm2, %v2457_v60, %v2463_v63 }
0x2f39   :  { %v2467_v2 = vpack.c.bf16 %v2464_v1, %v2464_v1 }
0x2f3b   :  { %2656 = vmatmul.mubr.msk.bf16.vlgmr.msra.gmra.mrb[48].mxu0 %vm50_vm1, %v2467_v2  ;;  %vm2546_vm1 = vcmask 162816  }
0x300e   :  { %v2519_v8 = vpop.f32.mrb[48].mxu0 }
0x300f   :  { %v2520_v18 = vadd.f32 %v2519_v8, %v2471_v4  ;;  %v2521_v24 = vpop.f32.mrb[49].mxu0 }
0x3010   :  { %v2522_v10 = vpop.f32.mrb[50].mxu0 }
0x3011   :  { %v2523_v11 = vpop.f32.mrb[51].mxu0  ;;  %v2526_v12 = vsel %vm2525_vm3, %v2520_v18, -inf }
0x3012   :  { %2527 = vmax.xlane.f32.xlu0 %v2526_v12 }
0x3028   :  { %2538 = vrot.lane.b32.xlu0 %v2357_v45, %s3197_s3 }
0x309f   :  { %v2528_v13 = vpop.xlane.xlu0 %2527 }
0x30a0   :  { %v2529_v14 = vsub.f32 %v2520_v18, %v2528_v13 }
0x30a2   :  { %v2530_v15 = vmul.f32 1.442695, %v2529_v14 }
0x30a3   :  { %v2539_v19 = vpop.permute.xlu0 %2538 }
0x30a4   :  { %3186 = vpow2.f32 %v2530_v15 }
0x30ae   :  { %v3187_v16 = vpop.eup %3186 }
0x30af   :  { %v2532_v17 = vsel %vm2525_vm3, %v3187_v16, 0.0 }
0x30b0   :  { %2533 = vadd.xlane.f32.xlu1 %v2532_v17 }
0x30c1   :  { %2542 = vrot.lane.b32.xlu1 %v2457_v60, %s3198_s2 }
0x313d   :  { %v2534_v9 = vpop.xlane.xlu1 %2533 }
0x313e   :  { %3188 = vrcp.f32 %v2534_v9 }
0x3141   :  { %v2543_v20 = vpop.permute.xlu1 %2542 }
0x3148   :  { %v3189_v42 = vpop.eup %3188 }
0x3149   :  { %v2536_v47 = vmul.f32 %v3189_v42, %v3187_v16 }
0x314b   :  { %v2545_v21 = vsel %vm2035_vm11, %v2536_v47, %v2539_v19 }
0x314c   :  { %v2547_v22 = vsel %vm2546_vm1, %v2545_v21, %v2543_v20 }
0x314d   :  { %v2549_v23 = vsel %vm2548_vm4, %v2547_v22, 0.0 }
0x314e   :  { %2550 = vst [vmem:[%s3815_s5] sm:$0x3] %v2549_v23 }

</bundles_post_ra>
